<compile_context>
chip_gen: v5e
topology: v5e:2x2
jax: 0.10.0
libtpu: 0.0.40
codegen_flags: <defaults>
</compile_context>

<pallas_src>
import jax
import jax.numpy as jnp
from jax.experimental import pallas as pl
from jax.experimental.pallas import tpu as pltpu

BN_EPS = 1e-5


def _round_up(n, m):
    return ((n + m - 1) // m) * m


def _cdiv(a, b):
    return -(-a // b)


def _choose_block_b(B, cap=512):
    """Pick the batch tile.

    Preference order:
      1. a multiple of 8 that divides B (no wrapper-side pad/copy of x),
      2. leaves >= 2 grid steps (so the batch axis can shard across v7x's two
         TensorCores via dimension_semantics=("parallel",)),
      3. a multiple of 128 (full MXU rows), largest such tile,
    capped at `cap` (512 default: safe within v5e's 16 MiB scoped-VMEM default).
    If no reasonable divisor exists, fall back to roughly-equal padded tiles.
    """
    cap = max(8, min(cap, _round_up(B, 8)))
    divisors = [d for d in range(8, cap + 1, 8) if B % d == 0]
    if divisors:
        best = max(divisors, key=lambda d: (B // d >= 2, d % 128 == 0, d))
        if best >= 128 or B <= 256:
            return best
    # Pad path: roughly equal tiles so padding waste stays < 8 rows per step.
    n_steps = _cdiv(B, cap)
    return _round_up(_cdiv(B, n_steps), 8)


def _classifier_kernel(x_ref, w1_ref, b1_ref, w2_ref, b2_ref, o_ref):
    # BatchNorm is pre-folded into (w1, b1) by the wrapper.
    # ---- Linear(768, 768) + ReLU : bf16 MXU matmul, f32 accumulate ----
    xb = x_ref[...].astype(w1_ref.dtype)                       # (tm, 768) bf16
    h = jnp.dot(xb, w1_ref[...],
                preferred_element_type=jnp.float32) + b1_ref[...]
    h = jnp.maximum(h, 0.0)

    # ---- Linear(768, L_padded) : bf16 MXU matmul, f32 accumulate ----
    o_ref[...] = (jnp.dot(h.astype(w2_ref.dtype), w2_ref[...],
                          preferred_element_type=jnp.float32)
                  + b2_ref[...]).astype(o_ref.dtype)            # bf16 store


def two_layer_classifier_do_forward(x, gamma, beta, running_mean, running_var,
                                     w1, b1, w2, b2, *, block_b=None,
                                     block_b_cap=512):
    """x: (B, 768).  w1: (768, 768) [in, out], w2: (768, L) [in, out].

    Returns f32 logits of shape (B, L).
    """
    B, D = x.shape
    L = w2.shape[1]

    # Lane-dense output: pad the label dim up to a multiple of 128 (and no
    # further -- padding to 256 would only double work on zeros).
    LP = _round_up(max(L, 128), 128)

    if block_b is None:
        block_b = _choose_block_b(B, cap=block_b_cap)
    block_b = max(8, min(_round_up(block_b, 8), _round_up(B, 8)))
    BP = _round_up(B, block_b)

    # ---- Fold eval-mode BatchNorm into the first Linear (f32, pre-bf16) ----
    #   BN(x) = x * scale + shift,  scale = gamma * rsqrt(var + eps),
    #                               shift = beta - mean * scale
    #   BN(x) @ w1 + b1 = x @ (scale[:, None] * w1) + (shift @ w1 + b1)
    f32 = lambda a: a.astype(jnp.float32)
    scale = f32(gamma) * jax.lax.rsqrt(f32(running_var) + BN_EPS)   # (D,)
    shift = f32(beta) - f32(running_mean) * scale                   # (D,)
    w1_folded = f32(w1) * scale[:, None]                            # (D, D) f32
    b1_folded = f32(b1) + shift @ f32(w1)                           # (D,)   f32

    # bf16 weights (MXU-native); w2 zero-padded to 128 output lanes.
    w1_bf = w1_folded.astype(jnp.bfloat16)
    w2_bf = jnp.zeros((D, LP), jnp.bfloat16).at[:, :L].set(w2.astype(jnp.bfloat16))
    b1_row = b1_folded.reshape(1, D)
    b2_row = jnp.zeros((1, LP), jnp.float32).at[:, :L].set(f32(b2))

    # x passes through in its incoming dtype (f32 or bf16); only padded when
    # the tile chooser could not find a divisor of B.
    x_in = x
    if BP != B:
        x_in = jnp.pad(x_in, ((0, BP - B), (0, 0)))

    tiled = lambda shape: pl.BlockSpec(shape, lambda i: (i, 0))     # batch-tiled
    resident = lambda shape: pl.BlockSpec(shape, lambda i: (0, 0))  # stays resident

    out = pl.pallas_call(
        _classifier_kernel,
        out_shape=jax.ShapeDtypeStruct((BP, LP), jnp.bfloat16),
        grid=(BP // block_b,),
        in_specs=[
            tiled((block_b, D)),     # x
            resident((D, D)),        # w1 (BN-folded, bf16)
            resident((1, D)),        # b1 (BN-folded, f32)
            resident((D, LP)),       # w2 (bf16, label dim padded to 128)
            resident((1, LP)),       # b2 (f32, padded)
        ],
        out_specs=tiled((block_b, LP)),
        compiler_params=pltpu.CompilerParams(
            dimension_semantics=("parallel",)),
    )(x_in, w1_bf, b1_row, w2_bf, b2_row)

    return out[:B, :L].astype(jnp.float32)


def _reference(x, gamma, beta, mean, var, w1, b1, w2, b2):
    """Pure-JAX reference with the same BN fold and bf16 rounding as the kernel."""
    bf = lambda a: a.astype(jnp.bfloat16).astype(jnp.float32)
    f32 = lambda a: a.astype(jnp.float32)
    scale = f32(gamma) * jax.lax.rsqrt(f32(var) + BN_EPS)
    shift = f32(beta) - f32(mean) * scale
    w1_f = bf(f32(w1) * scale[:, None])
    b1_f = f32(b1) + shift @ f32(w1)
    h = jnp.maximum(jnp.dot(bf(f32(x)), w1_f) + b1_f, 0.0)
    out = jnp.dot(bf(h), bf(w2)) + f32(b2)
    return bf(out)   # kernel emits bf16 logits


if __name__ == "__main__":
    D = 768            # fixed by the module: BatchNorm1d(768), Linear(768, .)
    B = 32             # small demo batch -> block_b=16, 2-step grid, no padding
    NUM_LABELS = 16

    key = jax.random.PRNGKey(0)
    (k_x, k_g, k_b, k_m, k_v, k_w1, k_b1, k_w2, k_b2) = jax.random.split(key, 9)

    x = jax.random.normal(k_x, (B, D), dtype=jnp.float32)

    gamma = jnp.ones((D,), jnp.float32) + 0.01 * jax.random.normal(k_g, (D,))
    beta = 0.01 * jax.random.normal(k_b, (D,))
    running_mean = 0.1 * jax.random.normal(k_m, (D,))
    running_var = jnp.ones((D,), jnp.float32) + 0.05 * jax.random.uniform(k_v, (D,))

    # PyTorch Linear weight is (out, in); we store transposed (in, out) for x @ W.
    w1 = jax.random.normal(k_w1, (D, D), dtype=jnp.float32) * (1.0 / jnp.sqrt(D))
    b1 = 0.01 * jax.random.normal(k_b1, (D,))
    w2 = (jax.random.normal(k_w2, (D, NUM_LABELS), dtype=jnp.float32)
          * (1.0 / jnp.sqrt(D)))
    b2 = 0.01 * jax.random.normal(k_b2, (NUM_LABELS,))

    out = two_layer_classifier_do_forward(
        x, gamma, beta, running_mean, running_var, w1, b1, w2, b2)
    out = jax.block_until_ready(out)

    ref = _reference(x, gamma, beta, running_mean, running_var, w1, b1, w2, b2)
    assert out.shape == (B, NUM_LABELS)
    assert jnp.allclose(out, ref, atol=1e-2, rtol=1e-2), "mismatch vs reference"

    print("KERNEL_OK")
</pallas_src>

<mosaic_0001>
module attributes {stable_mosaic.version = 11 : i64} {
  func.func @_classifier_kernel(%arg0: i32, %arg1: memref<16x768xf32, #tpu.memory_space<vmem>>, %arg2: memref<768x768xbf16, #tpu.memory_space<vmem>>, %arg3: memref<1x768xf32, #tpu.memory_space<vmem>>, %arg4: memref<768x128xbf16, #tpu.memory_space<vmem>>, %arg5: memref<1x128xf32, #tpu.memory_space<vmem>>, %arg6: memref<16x128xbf16, #tpu.memory_space<vmem>>) attributes {dimension_semantics = [#tpu.dimension_semantics<parallel>], iteration_bounds = array<i64: 2>, scalar_prefetch = 0 : i64, scratch_operands = 0 : i64, tpu.core_type = #tpu.core_type<tc>, window_params = [{transform_indices = @transform_0, window_bounds = array<i64: 16, 768>}, {pipeline_mode = #tpu.pipeline_mode<synchronous>, transform_indices = @transform_1, window_bounds = array<i64: 768, 768>}, {pipeline_mode = #tpu.pipeline_mode<synchronous>, transform_indices = @transform_2, window_bounds = array<i64: 1, 768>}, {pipeline_mode = #tpu.pipeline_mode<synchronous>, transform_indices = @transform_3, window_bounds = array<i64: 768, 128>}, {pipeline_mode = #tpu.pipeline_mode<synchronous>, transform_indices = @transform_4, window_bounds = array<i64: 1, 128>}, {transform_indices = @transform_5, window_bounds = array<i64: 16, 128>}]} {
    %c0 = arith.constant 0 : index
    %c0_0 = arith.constant 0 : index
    %0 = vector.load %arg1[%c0, %c0_0] : memref<16x768xf32, #tpu.memory_space<vmem>>, vector<16x768xf32>
    %1 = arith.truncf %0 : vector<16x768xf32> to vector<16x768xbf16>
    %c0_1 = arith.constant 0 : index
    %c0_2 = arith.constant 0 : index
    %2 = vector.load %arg2[%c0_1, %c0_2] : memref<768x768xbf16, #tpu.memory_space<vmem>>, vector<768x768xbf16>
    %cst = arith.constant dense<0.000000e+00> : vector<16x768xf32>
    %3 = tpu.matmul %1, %2, %cst {dimension_numbers = #tpu.dot_dimension_numbers<[1], [0], [0], [1], [0, 0, 1, 1], [], []>} : vector<16x768xbf16>, vector<768x768xbf16>, vector<16x768xf32> -> vector<16x768xf32>
    %c0_3 = arith.constant 0 : index
    %c0_4 = arith.constant 0 : index
    %4 = vector.load %arg3[%c0_3, %c0_4] : memref<1x768xf32, #tpu.memory_space<vmem>>, vector<1x768xf32>
    %5 = vector.broadcast %4 : vector<1x768xf32> to vector<16x768xf32>
    %6 = arith.addf %3, %5 : vector<16x768xf32>
    %cst_5 = arith.constant 0.000000e+00 : f32
    %7 = vector.broadcast %cst_5 : f32 to vector<16x768xf32>
    %8 = arith.maximumf %6, %7 : vector<16x768xf32>
    %9 = arith.truncf %8 : vector<16x768xf32> to vector<16x768xbf16>
    %c0_6 = arith.constant 0 : index
    %c0_7 = arith.constant 0 : index
    %10 = vector.load %arg4[%c0_6, %c0_7] : memref<768x128xbf16, #tpu.memory_space<vmem>>, vector<768x128xbf16>
    %cst_8 = arith.constant dense<0.000000e+00> : vector<16x128xf32>
    %11 = tpu.matmul %9, %10, %cst_8 {dimension_numbers = #tpu.dot_dimension_numbers<[1], [0], [0], [1], [0, 0, 1, 1], [], []>} : vector<16x768xbf16>, vector<768x128xbf16>, vector<16x128xf32> -> vector<16x128xf32>
    %c0_9 = arith.constant 0 : index
    %c0_10 = arith.constant 0 : index
    %12 = vector.load %arg5[%c0_9, %c0_10] : memref<1x128xf32, #tpu.memory_space<vmem>>, vector<1x128xf32>
    %13 = vector.broadcast %12 : vector<1x128xf32> to vector<16x128xf32>
    %14 = arith.addf %11, %13 : vector<16x128xf32>
    %15 = arith.truncf %14 : vector<16x128xf32> to vector<16x128xbf16>
    %c0_11 = arith.constant 0 : index
    %c0_12 = arith.constant 0 : index
    %16 = vector.load %arg6[%c0_11, %c0_12] : memref<16x128xbf16, #tpu.memory_space<vmem>>, vector<16x128xbf16>
    tpu.vector_store %arg6[%c0_11, %c0_12], %15 {strides = array<i32>} : memref<16x128xbf16, #tpu.memory_space<vmem>>, vector<16x128xbf16>,
    return
  }
  func.func @transform_0(%arg0: i32) -> (i32, i32) {
    %c0_i32 = arith.constant 0 : i32
    %c0_i32_0 = arith.constant 0 : i32
    return %arg0, %c0_i32 : i32, i32
  }
  func.func @transform_1(%arg0: i32) -> (i32, i32) {
    %c0_i32 = arith.constant 0 : i32
    %c0_i32_0 = arith.constant 0 : i32
    %c0_i32_1 = arith.constant 0 : i32
    return %c0_i32, %c0_i32_0 : i32, i32
  }
  func.func @transform_2(%arg0: i32) -> (i32, i32) {
    %c0_i32 = arith.constant 0 : i32
    %c0_i32_0 = arith.constant 0 : i32
    %c0_i32_1 = arith.constant 0 : i32
    return %c0_i32, %c0_i32_0 : i32, i32
  }
  func.func @transform_3(%arg0: i32) -> (i32, i32) {
    %c0_i32 = arith.constant 0 : i32
    %c0_i32_0 = arith.constant 0 : i32
    %c0_i32_1 = arith.constant 0 : i32
    return %c0_i32, %c0_i32_0 : i32, i32
  }
  func.func @transform_4(%arg0: i32) -> (i32, i32) {
    %c0_i32 = arith.constant 0 : i32
    %c0_i32_0 = arith.constant 0 : i32
    %c0_i32_1 = arith.constant 0 : i32
    return %c0_i32, %c0_i32_0 : i32, i32
  }
  func.func @transform_5(%arg0: i32) -> (i32, i32) {
    %c0_i32 = arith.constant 0 : i32
    %c0_i32_0 = arith.constant 0 : i32
    return %arg0, %c0_i32 : i32, i32
  }
}

</mosaic_0001>

<bundles_post_ra>
// kernel: tpu_custom_call.1
= control target key start
LH: loop header
LB: loop body
LE: loop exit
PB: predicated region body
PF: predicated region fallthrough
CT: control target
= control target key end

     0   :  { %s5578_s0 = inlined_call_operand.hbm [shape: f32[32,768], index: 0, kind: input, shape index: {}]   ;;  %s5579_s1 = inlined_call_operand.hbm [shape: bf16[768,768], index: 1, kind: input, shape index: {}]   ;;  %s5580_s2 = inlined_call_operand.hbm [shape: f32[1,768], index: 2, kind: input, shape index: {}]   ;;  %s5581_s3 = inlined_call_operand.hbm [shape: bf16[768,128], index: 3, kind: input, shape index: {}]   ;;  %s5582_s4 = inlined_call_operand.hbm [shape: f32[1,128], index: 4, kind: input, shape index: {}]   ;;  %s5583_s5 = inlined_call_operand.hbm [shape: bf16[32,128], index: 5, kind: output, shape index: {}]  }
   0x1   :  { %5584 = sst [smem:[#allocation16_spill]] %s5579_s1 }
   0x2   :  { %10 = vsyncpa [#allocation3], 0 }
   0x3   :  { %12 = vsyncpa [#allocation3 + $0x1], 0 }
   0x4   :  { %13 = vsyncpa [#allocation6], 0 }
   0x5   :  { %14 = vsyncpa [#allocation9], 0 }
   0x6   :  { %15 = vsyncpa [#allocation4], 0 }
   0x7   :  { %17 = vsyncpa [#allocation4 + $0x1], 0  ;;  %s5269_s18 = smov 0   ;;  %s5271_s19 = smov 0  }
   0x8   :  { %s5273_s20 = smov 0   ;;  %s5275_s21 = smov 0  }
   0x9 LB: > { %s5290_s22 = sadd.s32 4294967295, %s5225_s21   ;;  %s3195_s23 = sadd.s32 4294967294, %s5225_s21   ;;  %s5225_s21 = sphi %s5275_s21, %s5596_s21   ;;  %s5221_s20 = sphi %s5273_s20, %s5595_s20   ;;  %s5217_s19 = sphi %s5271_s19, %s5594_s19   ;;  %s5213_s18 = sphi %s5269_s18, %s5593_s18  }
   0xa   : > { %p43_p0 = scmp.ne.s32.totalorder %s5217_s19, %s5213_s18  ;;  %p44_p1 = scmp.eq.s32.totalorder %s5290_s22, 0 }
   0xb   : > { %p151_p2 = scmp.eq.s32.totalorder %s5290_s22, 1  ;;  %p157_p3 = scmp.eq.s32.totalorder %s3195_s23, 1 }
   0xc   : > { %p5299_p4 = por %p44_p1, %p43_p0  ;;  %p3196_p5 = scmp.ge.s32.totalorder %s5225_s21, 1 }
   0xd   : > { %p5304_p6 = por %p157_p3, %p43_p0  ;;  %p164_p7 = scmp.lt.s32.totalorder %s5225_s21, 3 }
   0xe   : > { %s5587_s1 = sld [smem:[#allocation16_spill]]  ;;  %s5227_s30 = smov [#allocation5]  }
   0xf   : > { %p5312_p8 = pnand %p3196_p5, %p164_p7  ;;  %s177_s6 = sshll.u32 %s5227_s30, 4  ;;  %s178_s6 = int_to_ptr.vmem [resolvable:$true] %s177_s6 }
  0x10   : > { %s201_s10 = sshll.u32 %s5581_s3, 4  ;;  %s5228_s11 = smov 384   ;;  %s202_s10 = int_to_ptr.hbm [resolvable:$true] %s201_s10 }
  0x11   : > { %p4925_p9 = pneg %p5312_p8  ;;  %s5229_s12 = smov 24  }
  0x12   : > { %s5230_s13 = smov [#allocation8]   ;;  %s5231_s15 = smov 64  }
  0x13   : > { %p5320_p10 = pnand %p4925_p9, %p44_p1  ;;  %s203_s14 = sshll.u32 %s5230_s13, 4  ;;  %s204_s14 = int_to_ptr.vmem [resolvable:$true] %s203_s14 }
  0x14   : > { %s175_s28 = sshll.u32 %s5587_s1, 4  ;;  %s5232_s16 = smov 4   ;;  %s176_s28 = int_to_ptr.hbm [resolvable:$true] %s175_s28 }
  0x15   : > { %4928 = dma.hbm_to_vmem [thread:$0]  (!%p5320_p10), %s176_s28, 36864, %s178_s6, [#allocation6], %s5228_s11, %s5228_s11, %s5229_s12  }
  0x16   : > { %4934 = dma.hbm_to_vmem [thread:$0]  (!%p5320_p10), %s202_s10, 6144, %s204_s14, [#allocation9], %s5231_s15, %s5231_s15, %s5232_s16  }
  0x17   : > { %s190_s26 = sshll.u32 %s5580_s2, 4  ;;  %s5233_s27 = smov [#allocation7]   ;;  %s191_s26 = int_to_ptr.hbm [resolvable:$true] %s190_s26 }
  0x18   : > { %s192_s28 = sshll.u32 %s5233_s27, 4  ;;  %s216_s8 = sshll.u32 %s5582_s4, 4  ;;  %s193_s28 = int_to_ptr.vmem [resolvable:$true] %s192_s28  ;;  %s217_s8 = int_to_ptr.hbm [resolvable:$true] %s216_s8 }
  0x19   : > { %4931 = dma.hbm_to_vmem [thread:$0]  (!%p5320_p10), %s191_s26, 96, %s193_s28, [#allocation6]  }
  0x1a   : > { %s5234_s9 = smov [#allocation10]   ;;  %s5343_s11 = sadd.s32 1, %s5225_s21  }
  0x1b   : > { %s218_s10 = sshll.u32 %s5234_s9, 4  ;;  %s30_s12 = sadd.s32 1, %s5221_s20  ;;  %s219_s10 = int_to_ptr.vmem [resolvable:$true] %s218_s10 }
  0x1c   : > { %4937 = dma.hbm_to_vmem [thread:$0]  (!%p5320_p10), %s217_s8, 16, %s219_s10, [#allocation9]  }
  0x1d   : > { %s27_s13 = ssub.s32 %s5225_s21, %s5343_s11  ;;  %p37_p12 = scmp.ne.s32.totalorder %s5221_s20, %s5217_s19 }
  0x1e   : > { %p28_p13 = scmp.eq.s32.totalorder %s27_s13, 0  ;;  %p38_p0 = scmp.eq.s32.totalorder %s5225_s21, 0 }
  0x1f   : > { %p5353_p3 = por %p151_p2, %p37_p12  ;;  %p4950_p5 = scmp.lt.s32.totalorder %s5225_s21, 2 }
  0x20   : > { %s5359_s15 = scalar_select %p28_p13, %s5221_s20, %s30_s12  }
  0x21   : > { %p39_p7 = por %p38_p0, %p37_p12  ;;  %s229_s16 = sand.u32 1, %s5221_s20  }
  0x22   : > { %s4902_s7 = smul.u32 96, %s229_s16  ;;  %s230_s9 = scalar_lea.sflag [#allocation3], %s229_s16 }
  0x23   : > { %s4903_s17 = smul.u32 96, %s5225_s21  ;;  %p5363_p9 = pnand %p4950_p5, %p39_p7 }
  0x24   : > { %s233_s30 = scalar_lea.vmem [#allocation2], %s4902_s7  ;;  %s5128_s26 = scalar_lea.hbm %s5578_s0, 192 }
  0x25   : > { %s239_s28 = scalar_lea.hbm %s5578_s0, %s4903_s17  ;;  %s242_s6 = sshll.u32 %s233_s30, 4  ;;  %s243_s6 = int_to_ptr.vmem [resolvable:$true] %s242_s6 }
  0x26   : > { %s240_s8 = sshll.u32 %s239_s28, 4  ;;  %p5125_p10 = pneg %p5363_p9  ;;  %s241_s8 = int_to_ptr.hbm [resolvable:$true] %s240_s8 }
  0x27   : > { %s5121_s10 = sshra.s32 %s241_s8, 4  ;;  %s5122_s10 = int_to_ptr.hbm [resolvable:$true] %s5121_s10 }
  0x28   : > { %s5123_s12 = scalar_lea.hbm %s5122_s10, 96  ;;  %p5129_p0 = scmp.lt.s32.totalorder %s5122_s10, %s5578_s0 }
  0x29   : > { %p5124_p2 = scmp.ne.s32.totalorder %s5122_s10, %s5123_s12  ;;  %p5130_p5 = scmp.lt.s32.totalorder %s5128_s26, %s5123_s12 }
  0x2b   : > { %p5126_p12 = pnand %p5125_p10, %p5124_p2  ;;  %p5131_p7 = por %p5130_p5, %p5129_p0 }
  0x2d   : > { %p5127_p13 = pneg %p5126_p12 }
  0x2f   : > { %p5132_p11 = pnand %p5131_p7, %p5127_p13 }
  0x31   : > { %5135 = shalt.err (!%p5132_p11)
}
  0x32   : > { %s5235_s16 = smov 768   ;;  %s5236_s7 = smov 48  }
  0x33   : > { %4941 = dma.hbm_to_vmem [thread:$0]  (!%p5363_p9), %s241_s8, 1536, %s243_s6, %s230_s9, %s5235_s16, %s5235_s16, %s5236_s7  }
  0x34   : > { %254 = sbr.rel (%p5312_p8) target bundleno = 644 (0x284), region = 40  ;;  %s5383_s1 = sand.u32 (!%p5312_p8), 1, %s5217_s19  }
  0x35   : > { %s4904_s28 = smul.u32 (!%p5312_p8), 96, %s5383_s1  ;;  %s257_s30 = scalar_lea.sflag (!%p5312_p8), [#allocation3], %s5383_s1 }
  0x37   : > { %s5387_s10 = scalar_lea.vmem (!%p5312_p8), [#allocation2], %s4904_s28 }
  0x39   : > { %5196 = dma.done.wait (%p5299_p4), %s257_s30, 1536  }
  0x3a   : > { %5198 = vsyncadd (%p5299_p4), %s257_s30, 4294965760 }
  0x3b   : > { %5200 = dma.done.wait (%p44_p1), [#allocation6], 36960  }
  0x3c   : > { %5202 = vsyncadd (%p44_p1), [#allocation6], 4294930336 }
  0x3d   : > { %5204 = dma.done.wait (%p44_p1), [#allocation9], 6160  }
  0x3e   : > { %5206 = vsyncadd (%p44_p1), [#allocation9], 4294961136  ;;  %v3381_v0 = vld [vmem:[#allocation5 + $0x150] sm:$0xf]  ;;  %v4605_v1 = vld [vmem:[#allocation5 + $0x164] sm:$0xf0] }
  0x3f   : > { %v3573_v2 = vld [vmem:[#allocation5 + $0x2d0] sm:$0xf]  ;;  %v3382_v3 = vor.u32 %v4605_v1, %v3381_v0  ;;  %v4653_v4 = vld [vmem:[#allocation5 + $0x2e4] sm:$0xf0]  ;;  %v3357_v11 = vld [vmem:[#allocation5 + $0x120] sm:$0xf] }
  0x40   : > { %v3765_v5 = vld [vmem:[#allocation5 + $0x450] sm:$0xf]  ;;  %v4701_v6 = vld [vmem:[#allocation5 + $0x464] sm:$0xf0]  ;;  %v3574_v7 = vor.u32 %v4653_v4, %v3573_v2  ;;  %v4599_v13 = vld [vmem:[#allocation5 + $0x134] sm:$0xf0] }
  0x41   : > { %v3766_v8 = vor.u32 %v4701_v6, %v3765_v5  ;;  %v3957_v9 = vld [vmem:[#allocation5 + $0x5d0] sm:$0xf]  ;;  %v4749_v10 = vld [vmem:[#allocation5 + $0x5e4] sm:$0xf0]  ;;  %2070 = vmatpush.bf16.msra.mxu0 %v3382_v3  ;;  %v3549_v14 = vld [vmem:[#allocation5 + $0x2a0] sm:$0xf]  ;;  %v3358_v16 = vor.u32 %v4599_v13, %v3357_v11 }
  0x42   : > { %v3958_v12 = vor.u32 %v4749_v10, %v3957_v9  ;;  %v4647_v15 = vld [vmem:[#allocation5 + $0x2b4] sm:$0xf0]  ;;  %2084 = vmatpush.bf16.msra.mxu1 %v3574_v7  ;;  %v3741_v18 = vld [vmem:[#allocation5 + $0x420] sm:$0xf]  ;;  %v3333_v23 = vld [vmem:[#allocation5 + $0xf0] sm:$0xf] }
  0x43   : > { %2098 = vmatpush.bf16.msra.mxu2 %v3766_v8  ;;  %v3550_v17 = vor.u32 %v4647_v15, %v3549_v14  ;;  %v4695_v19 = vld [vmem:[#allocation5 + $0x434] sm:$0xf0]  ;;  %v3933_v20 = vld [vmem:[#allocation5 + $0x5a0] sm:$0xf]  ;;  %v4593_v24 = vld [vmem:[#allocation5 + $0x104] sm:$0xf0] }
  0x44   : > { %2112 = vmatpush.bf16.msra.mxu3 %v3958_v12  ;;  %v3742_v21 = vor.u32 %v4695_v19, %v3741_v18  ;;  %v4743_v22 = vld [vmem:[#allocation5 + $0x5b4] sm:$0xf0]  ;;  %v3525_v26 = vld [vmem:[#allocation5 + $0x270] sm:$0xf]  ;;  %v4641_v27 = vld [vmem:[#allocation5 + $0x284] sm:$0xf0]  ;;  %v3334_v29 = vor.u32 %v4593_v24, %v3333_v23 }
  0x45   : > { %v3934_v25 = vor.u32 %v4743_v22, %v3933_v20  ;;  %v3717_v28 = vld [vmem:[#allocation5 + $0x3f0] sm:$0xf]  ;;  %2071 = vmatpush.bf16.msra.mxu0 %v3358_v16  ;;  %v4689_v30 = vld [vmem:[#allocation5 + $0x404] sm:$0xf0]  ;;  %v3526_v33 = vor.u32 %v4641_v27, %v3525_v26  ;;  %v3309_v35 = vld [vmem:[#allocation5 + $0xc0] sm:$0xf] }
  0x46   : > { %v3909_v31 = vld [vmem:[#allocation5 + $0x570] sm:$0xf]  ;;  %v4737_v32 = vld [vmem:[#allocation5 + $0x584] sm:$0xf0]  ;;  %2085 = vmatpush.bf16.msra.mxu1 %v3550_v17  ;;  %v3718_v34 = vor.u32 %v4689_v30, %v3717_v28  ;;  %v4587_v36 = vld [vmem:[#allocation5 + $0xd4] sm:$0xf0] }
  0x47   : > { %2099 = vmatpush.bf16.msra.mxu2 %v3742_v21  ;;  %v3501_v37 = vld [vmem:[#allocation5 + $0x240] sm:$0xf]  ;;  %v3910_v38 = vor.u32 %v4737_v32, %v3909_v31  ;;  %v4635_v39 = vld [vmem:[#allocation5 + $0x254] sm:$0xf0]  ;;  %v3310_v44 = vor.u32 %v4587_v36, %v3309_v35  ;;  %v3285_v47 = vld [vmem:[#allocation5 + $0x90] sm:$0xf] }
  0x48   : > { %2113 = vmatpush.bf16.msra.mxu3 %v3934_v25  ;;  %v3693_v40 = vld [vmem:[#allocation5 + $0x3c0] sm:$0xf]  ;;  %v4683_v41 = vld [vmem:[#allocation5 + $0x3d4] sm:$0xf0]  ;;  %v3502_v45 = vor.u32 %v4635_v39, %v3501_v37  ;;  %v4581_v48 = vld [vmem:[#allocation5 + $0xa4] sm:$0xf0] }
  0x49   : > { %v3885_v42 = vld [vmem:[#allocation5 + $0x540] sm:$0xf]  ;;  %v4731_v43 = vld [vmem:[#allocation5 + $0x554] sm:$0xf0]  ;;  %2072 = vmatpush.bf16.msra.mxu0 %v3334_v29  ;;  %v3694_v46 = vor.u32 %v4683_v41, %v3693_v40  ;;  %v3477_v49 = vld [vmem:[#allocation5 + $0x210] sm:$0xf]  ;;  %v3286_v56 = vor.u32 %v4581_v48, %v3285_v47 }
  0x4a   : > { %2086 = vmatpush.bf16.msra.mxu1 %v3526_v33  ;;  %v3886_v50 = vor.u32 %v4731_v43, %v3885_v42  ;;  %v4629_v51 = vld [vmem:[#allocation5 + $0x224] sm:$0xf0]  ;;  %v3669_v52 = vld [vmem:[#allocation5 + $0x390] sm:$0xf]  ;;  %v3261_v59 = vld [vmem:[#allocation5 + $0x60] sm:$0xf] }
  0x4b   : > { %2100 = vmatpush.bf16.msra.mxu2 %v3718_v34  ;;  %v4677_v53 = vld [vmem:[#allocation5 + $0x3a4] sm:$0xf0]  ;;  %v3861_v54 = vld [vmem:[#allocation5 + $0x510] sm:$0xf]  ;;  %v3478_v57 = vor.u32 %v4629_v51, %v3477_v49  ;;  %v4575_v60 = vld [vmem:[#allocation5 + $0x74] sm:$0xf0] }
  0x4c   : > { %2114 = vmatpush.bf16.msra.mxu3 %v3910_v38  ;;  %v4725_v55 = vld [vmem:[#allocation5 + $0x524] sm:$0xf0]  ;;  %v3670_v58 = vor.u32 %v4677_v53, %v3669_v52  ;;  %v3453_v61 = vld [vmem:[#allocation5 + $0x1e0] sm:$0xf]  ;;  %v4623_v63 = vld [vmem:[#allocation5 + $0x1f4] sm:$0xf0]  ;;  %v3262_v4 = vor.u32 %v4575_v60, %v3261_v59 }
  0x4d   : > { %2073 = vmatpush.bf16.msra.mxu0 %v3310_v44  ;;  %v3862_v62 = vor.u32 %v4725_v55, %v3861_v54  ;;  %v3645_v0 = vld [vmem:[#allocation5 + $0x360] sm:$0xf]  ;;  %v4671_v1 = vld [vmem:[#allocation5 + $0x374] sm:$0xf0]  ;;  %v3454_v5 = vor.u32 %v4623_v63, %v3453_v61  ;;  %v3237_v7 = vld [vmem:[#allocation5 + $0x30] sm:$0xf] }
  0x4e   : > { %2087 = vmatpush.bf16.msra.mxu1 %v3502_v45  ;;  %v3837_v2 = vld [vmem:[#allocation5 + $0x4e0] sm:$0xf]  ;;  %v4719_v3 = vld [vmem:[#allocation5 + $0x4f4] sm:$0xf0]  ;;  %v3646_v6 = vor.u32 %v4671_v1, %v3645_v0  ;;  %v4569_v8 = vld [vmem:[#allocation5 + $0x44] sm:$0xf0] }
  0x4f   : > { %2101 = vmatpush.bf16.msra.mxu2 %v3694_v46  ;;  %v3429_v9 = vld [vmem:[#allocation5 + $0x1b0] sm:$0xf]  ;;  %v3838_v10 = vor.u32 %v4719_v3, %v3837_v2  ;;  %v4617_v11 = vld [vmem:[#allocation5 + $0x1c4] sm:$0xf0]  ;;  %v3238_v16 = vor.u32 %v4569_v8, %v3237_v7  ;;  %v3213_v17 = vld [vmem:[#allocation5] sm:$0xf] }
  0x50   : > { %2115 = vmatpush.bf16.msra.mxu3 %v3886_v50  ;;  %v3621_v12 = vld [vmem:[#allocation5 + $0x330] sm:$0xf]  ;;  %v4665_v13 = vld [vmem:[#allocation5 + $0x344] sm:$0xf0]  ;;  %v4563_v18 = vld [vmem:[#allocation5 + $0x14] sm:$0xf0]  ;;  %v3430_v19 = vor.u32 %v4617_v11, %v3429_v9 }
  0x51   : > { %2074 = vmatpush.bf16.msra.mxu0 %v3286_v56  ;;  %v3813_v14 = vld [vmem:[#allocation5 + $0x4b0] sm:$0xf]  ;;  %v4713_v15 = vld [vmem:[#allocation5 + $0x4c4] sm:$0xf0]  ;;  %v3622_v20 = vor.u32 %v4665_v13, %v3621_v12  ;;  %v3405_v21 = vld [vmem:[#allocation5 + $0x180] sm:$0xf]  ;;  %v3214_v31 = vor.u32 %v4563_v18, %v3213_v17 }
  0x52   : > { %2088 = vmatpush.bf16.msra.mxu1 %v3478_v57  ;;  %v4611_v22 = vld [vmem:[#allocation5 + $0x194] sm:$0xf0]  ;;  %v3597_v23 = vld [vmem:[#allocation5 + $0x300] sm:$0xf]  ;;  %v3814_v24 = vor.u32 %v4713_v15, %v3813_v14  ;;  %v4149_v28 = vld [vmem:[#allocation5 + $0x750] sm:$0xf] }
  0x53   : > { %2102 = vmatpush.bf16.msra.mxu2 %v3670_v58  ;;  %v4659_v25 = vld [vmem:[#allocation5 + $0x314] sm:$0xf0]  ;;  %v3789_v26 = vld [vmem:[#allocation5 + $0x480] sm:$0xf]  ;;  %v4797_v29 = vld [vmem:[#allocation5 + $0x764] sm:$0xf0]  ;;  %v3406_v35 = vor.u32 %v4611_v22, %v3405_v21 }
  0x54   : > { %2116 = vmatpush.bf16.msra.mxu3 %v3862_v62  ;;  %v4707_v27 = vld [vmem:[#allocation5 + $0x494] sm:$0xf0]  ;;  %v4341_v30 = vld [vmem:[#allocation5 + $0x8d0] sm:$0xf]  ;;  %v4845_v32 = vld [vmem:[#allocation5 + $0x8e4] sm:$0xf0]  ;;  %v3598_v36 = vor.u32 %v4659_v25, %v3597_v23  ;;  %v4150_v40 = vor.u32 %v4797_v29, %v4149_v28 }
  0x55   : > { %2075 = vmatpush.bf16.msra.mxu0 %v3262_v4  ;;  %v4602_v33 = vld [vmem:[#allocation5 + $0x154] sm:$0xf]  ;;  %v3383_v34 = vld [vmem:[#allocation5 + $0x168] sm:$0xf0]  ;;  %v3790_v39 = vor.u32 %v4707_v27, %v3789_v26  ;;  %v4125_v41 = vld [vmem:[#allocation5 + $0x720] sm:$0xf]  ;;  %v4342_v42 = vor.u32 %v4845_v32, %v4341_v30 }
  0x56   : > { %2089 = vmatpush.bf16.msra.mxu1 %v3454_v5  ;;  %v4650_v37 = vld [vmem:[#allocation5 + $0x2d4] sm:$0xf]  ;;  %v3575_v38 = vld [vmem:[#allocation5 + $0x2e8] sm:$0xf0]  ;;  %v3386_v43 = vor.u32 %v4602_v33, %v3383_v34  ;;  %v4791_v44 = vld [vmem:[#allocation5 + $0x734] sm:$0xf0] }
  0x57   : > { %2103 = vmatpush.bf16.msra.mxu2 %v3646_v6  ;;  %v4317_v45 = vld [vmem:[#allocation5 + $0x8a0] sm:$0xf]  ;;  %v4839_v46 = vld [vmem:[#allocation5 + $0x8b4] sm:$0xf0]  ;;  %v3578_v47 = vor.u32 %v4650_v37, %v3575_v38  ;;  %v4596_v48 = vld [vmem:[#allocation5 + $0x124] sm:$0xf]  ;;  %v4126_v54 = vor.u32 %v4791_v44, %v4125_v41 }
  0x58   : > { %2117 = vmatpush.bf16.msra.mxu3 %v3838_v10  ;;  %v3359_v49 = vld [vmem:[#allocation5 + $0x138] sm:$0xf0]  ;;  %v4644_v50 = vld [vmem:[#allocation5 + $0x2a4] sm:$0xf]  ;;  %v316_v53 = vld [vmem:[%s5387_s10 + $0x30] sm:$0xff]  ;;  %v4318_v58 = vor.u32 %v4839_v46, %v4317_v45  ;;  %s3210_s24 = sshll.u32 %s5383_s1, 3 }
  0x59   : > { %2076 = vmatpush.bf16.msra.mxu0 %v3238_v16  ;;  %v3551_v51 = vld [vmem:[#allocation5 + $0x2b8] sm:$0xf0]  ;;  %v310_v52 = vld [vmem:[%s5387_s10] sm:$0xff]  ;;  %v4101_v55 = vld [vmem:[#allocation5 + $0x6f0] sm:$0xf]  ;;  %v3362_v59 = vor.u32 %v4596_v48, %v3359_v49  ;;  %s4896_s29 = sshll.u32 %s5290_s22, 3 }
  0x5a   : > { %2090 = vmatpush.bf16.msra.mxu1 %v3430_v19  ;;  %v4785_v56 = vld [vmem:[#allocation5 + $0x704] sm:$0xf0]  ;;  %v5403_v57 = vpack.c.bf16 %v316_v53, %v310_v52  ;;  %v4293_v60 = vld [vmem:[#allocation5 + $0x870] sm:$0xf]  ;;  %v4590_v62 = vld [vmem:[#allocation5 + $0xf4] sm:$0xf]  ;;  %v3554_v63 = vor.u32 %v4644_v50, %v3551_v51  ;;  %s3080_s8 = scalar_lea.hbm %s5583_s5, %s4896_s29 }
  0x5b   : > { %2104 = vmatpush.bf16.msra.mxu2 %v3622_v20  ;;  %v4833_v61 = vld [vmem:[#allocation5 + $0x884] sm:$0xf0]  ;;  %v3335_v0 = vld [vmem:[#allocation5 + $0x108] sm:$0xf0]  ;;  %v317_v2 = vld [vmem:[%s5387_s10 + $0x38] sm:$0xff]  ;;  %v4102_v7 = vor.u32 %v4785_v56, %v4101_v55  ;;  %s307_s9 = scalar_lea.vmem [#allocation11], %s3210_s24 }
  0x5c   : > { %2118 = vmatpush.bf16.msra.mxu3 %v3814_v24  ;;  %v311_v1 = vld [vmem:[%s5387_s10 + $0x8] sm:$0xff]  ;;  %v4638_v3 = vld [vmem:[#allocation5 + $0x274] sm:$0xf]  ;;  %v4077_v5 = vld [vmem:[#allocation5 + $0x6c0] sm:$0xf]  ;;  %v4294_v11 = vor.u32 %v4833_v61, %v4293_v60  ;;  %v3338_v12 = vor.u32 %v4590_v62, %v3335_v0  ;;  %s3081_s12 = sshll.u32 %s307_s9, 4  ;;  %s3082_s12 = int_to_ptr.vmem [resolvable:$true] %s3081_s12 }
  0x5d   : > { %2077 = vmatpush.bf16.msra.mxu0 %v3214_v31  ;;  %v3527_v4 = vld [vmem:[#allocation5 + $0x288] sm:$0xf0]  ;;  %v5408_v6 = vpack.c.bf16 %v317_v2, %v311_v1  ;;  %v4779_v8 = vld [vmem:[#allocation5 + $0x6d4] sm:$0xf0]  ;;  %v4269_v9 = vld [vmem:[#allocation5 + $0x840] sm:$0xf] }
  0x5e   : > { %2091 = vmatpush.bf16.msra.mxu1 %v3406_v35  ;;  %v4827_v10 = vld [vmem:[#allocation5 + $0x854] sm:$0xf0]  ;;  %v4584_v13 = vld [vmem:[#allocation5 + $0xc4] sm:$0xf]  ;;  %v3311_v14 = vld [vmem:[#allocation5 + $0xd8] sm:$0xf0]  ;;  %v3530_v16 = vor.u32 %v4638_v3, %v3527_v4  ;;  %v4078_v24 = vor.u32 %v4779_v8, %v4077_v5 }
  0x5f   : > { %2105 = vmatpush.bf16.msra.mxu2 %v3598_v36  ;;  %v312_v15 = vld [vmem:[%s5387_s10 + $0x10] sm:$0xff]  ;;  %v318_v17 = vld [vmem:[%s5387_s10 + $0x40] sm:$0xff]  ;;  %v313_v18 = vld [vmem:[%s5387_s10 + $0x18] sm:$0xff]  ;;  %v4270_v25 = vor.u32 %v4827_v10, %v4269_v9  ;;  %v3314_v26 = vor.u32 %v4584_v13, %v3311_v14  ;;  %s3083_s13 = sshll.u32 %s3080_s8, 4  ;;  %s3069_s22 = scalar_lea.sflag [#allocation4], %s5383_s1  ;;  %s3084_s13 = int_to_ptr.hbm [resolvable:$true] %s3083_s13 }
  0x60   : > { %2119 = vmatpush.bf16.msra.mxu3 %v3790_v39  ;;  %2078 = vmatmul.bf16.vlgmr.msra.gmra.mxu0 %v5403_v57  ;;  %v319_v19 = vld [vmem:[%s5387_s10 + $0x48] sm:$0xff]  ;;  %v4632_v20 = vld [vmem:[#allocation5 + $0x244] sm:$0xf]  ;;  %v3503_v21 = vld [vmem:[#allocation5 + $0x258] sm:$0xf0]  ;;  %v5415_v22 = vpack.c.bf16 %v318_v17, %v312_v15  ;;  %s5165_s26 = sshra.s32 %s3084_s13, 4  ;;  %s5166_s26 = int_to_ptr.hbm [resolvable:$true] %s5165_s26 }
  0x61   : > { %2126 = vmatpush.bf16.msrb.mxu0 %v4150_v40  ;;  %2092 = vmatmul.bf16.vlgmr.msra.gmra.mxu1 %v5408_v6  ;;  %v5417_v23 = vpack.c.bf16 %v319_v19, %v313_v18  ;;  %v4053_v27 = vld [vmem:[#allocation5 + $0x690] sm:$0xf]  ;;  %v4773_v28 = vld [vmem:[#allocation5 + $0x6a4] sm:$0xf0]  ;;  %v3506_v30 = vor.u32 %v4632_v20, %v3503_v21  ;;  %v4578_v32 = vld [vmem:[#allocation5 + $0x94] sm:$0xf]  ;;  %p5172_p11 = scmp.lt.s32.totalorder %s5166_s26, %s5583_s5 }
  0x62   : > { %2140 = vmatpush.bf16.msrb.mxu1 %v4342_v42  ;;  %v4245_v29 = vld [vmem:[#allocation5 + $0x810] sm:$0xf]  ;;  %v4821_v31 = vld [vmem:[#allocation5 + $0x824] sm:$0xf0]  ;;  %v3287_v33 = vld [vmem:[#allocation5 + $0xa8] sm:$0xf0]  ;;  %2106 = vmatmul.bf16.vlgmr.msra.gmra.mxu2 %v5415_v22  ;;  %v4054_v36 = vor.u32 %v4773_v28, %v4053_v27 }
  0x63   : > { %2154 = vmatpush.bf16.msrb.mxu2 %v3386_v43  ;;  %v4626_v34 = vld [vmem:[#allocation5 + $0x214] sm:$0xf]  ;;  %v3479_v35 = vld [vmem:[#allocation5 + $0x228] sm:$0xf0]  ;;  %2120 = vmatmul.bf16.vlgmr.msra.gmra.mxu3 %v5417_v23  ;;  %v4246_v37 = vor.u32 %v4821_v31, %v4245_v29  ;;  %v3290_v38 = vor.u32 %v4578_v32, %v3287_v33  ;;  %v4029_v39 = vld [vmem:[#allocation5 + $0x660] sm:$0xf] }
  0x64   : > { %2168 = vmatpush.bf16.msrb.mxu3 %v3578_v47  ;;  %v4767_v40 = vld [vmem:[#allocation5 + $0x674] sm:$0xf0]  ;;  %v4221_v41 = vld [vmem:[#allocation5 + $0x7e0] sm:$0xf]  ;;  %v3482_v42 = vor.u32 %v4626_v34, %v3479_v35  ;;  %v4572_v44 = vld [vmem:[#allocation5 + $0x64] sm:$0xf] }
  0x65   : > { %2127 = vmatpush.bf16.msrb.mxu0 %v4126_v54  ;;  %v4815_v43 = vld [vmem:[#allocation5 + $0x7f4] sm:$0xf0]  ;;  %v3263_v45 = vld [vmem:[#allocation5 + $0x78] sm:$0xf0]  ;;  %v4620_v46 = vld [vmem:[#allocation5 + $0x1e4] sm:$0xf]  ;;  %v4030_v48 = vor.u32 %v4767_v40, %v4029_v39 }
  0x66   : > { %2141 = vmatpush.bf16.msrb.mxu1 %v4318_v58  ;;  %v3455_v47 = vld [vmem:[#allocation5 + $0x1f8] sm:$0xf0]  ;;  %v4222_v49 = vor.u32 %v4815_v43, %v4221_v41  ;;  %v3266_v50 = vor.u32 %v4572_v44, %v3263_v45  ;;  %v4005_v51 = vld [vmem:[#allocation5 + $0x630] sm:$0xf]  ;;  %v4761_v52 = vld [vmem:[#allocation5 + $0x644] sm:$0xf0] }
  0x67   : > { %2155 = vmatpush.bf16.msrb.mxu2 %v3362_v59  ;;  %v4197_v53 = vld [vmem:[#allocation5 + $0x7b0] sm:$0xf]  ;;  %v3458_v54 = vor.u32 %v4620_v46, %v3455_v47  ;;  %v4809_v55 = vld [vmem:[#allocation5 + $0x7c4] sm:$0xf0]  ;;  %v4566_v56 = vld [vmem:[#allocation5 + $0x34] sm:$0xf]  ;;  %v4006_v61 = vor.u32 %v4761_v52, %v4005_v51 }
  0x68   : > { %2169 = vmatpush.bf16.msrb.mxu3 %v3554_v63  ;;  %v3239_v58 = vld [vmem:[#allocation5 + $0x48] sm:$0xf0]  ;;  %v4614_v59 = vld [vmem:[#allocation5 + $0x1b4] sm:$0xf]  ;;  %v3981_v62 = vld [vmem:[#allocation5 + $0x600] sm:$0xf]  ;;  %v4198_v1 = vor.u32 %v4809_v55, %v4197_v53 }
  0x69   : > { %2128 = vmatpush.bf16.msrb.mxu0 %v4102_v7  ;;  %v3431_v60 = vld [vmem:[#allocation5 + $0x1c8] sm:$0xf0]  ;;  %v4755_v63 = vld [vmem:[#allocation5 + $0x614] sm:$0xf0]  ;;  %v4173_v0 = vld [vmem:[#allocation5 + $0x780] sm:$0xf]  ;;  %v3242_v2 = vor.u32 %v4566_v56, %v3239_v58 }
  0x6a   : > { %2142 = vmatpush.bf16.msrb.mxu1 %v4294_v11  ;;  %v4803_v3 = vld [vmem:[#allocation5 + $0x794] sm:$0xf0]  ;;  %v4560_v4 = vld [vmem:[#allocation5 + $0x4] sm:$0xf]  ;;  %v3215_v5 = vld [vmem:[#allocation5 + $0x18] sm:$0xf0]  ;;  %v3434_v7 = vor.u32 %v4614_v59, %v3431_v60  ;;  %v3982_v14 = vor.u32 %v4755_v63, %v3981_v62 }
  0x6b   : > { %2156 = vmatpush.bf16.msrb.mxu2 %v3338_v12  ;;  %v4608_v8 = vld [vmem:[#allocation5 + $0x184] sm:$0xf]  ;;  %v3407_v9 = vld [vmem:[#allocation5 + $0x198] sm:$0xf0]  ;;  %v4698_v10 = vld [vmem:[#allocation5 + $0x454] sm:$0xf]  ;;  %v4174_v18 = vor.u32 %v4803_v3, %v4173_v0  ;;  %v3218_v19 = vor.u32 %v4560_v4, %v3215_v5 }
  0x6c   : > { %2170 = vmatpush.bf16.msrb.mxu3 %v3530_v16  ;;  %v3767_v11 = vld [vmem:[#allocation5 + $0x468] sm:$0xf0]  ;;  %v4746_v12 = vld [vmem:[#allocation5 + $0x5d4] sm:$0xf]  ;;  %v314_v21 = vld [vmem:[%s5387_s10 + $0x20] sm:$0xff]  ;;  %s5167_s27 = scalar_lea.hbm %s5166_s26, 8 }
  0x6d   : > { %2129 = vmatpush.bf16.msrb.mxu0 %v4078_v24  ;;  %v3959_v13 = vld [vmem:[#allocation5 + $0x5e8] sm:$0xf0]  ;;  %v4794_v15 = vld [vmem:[#allocation5 + $0x754] sm:$0xf]  ;;  %v321_v28 = vld [vmem:[%s5387_s10 + $0x58] sm:$0xff]  ;;  %p5168_p1 = scmp.ne.s32.totalorder %s5166_s26, %s5167_s27  ;;  %s5171_s7 = scalar_lea.hbm %s5583_s5, 16 }
  0x6e   : > { %2143 = vmatpush.bf16.msrb.mxu1 %v4270_v25  ;;  %v4151_v16 = vld [vmem:[#allocation5 + $0x768] sm:$0xf0]  ;;  %v4842_v17 = vld [vmem:[#allocation5 + $0x8d4] sm:$0xf]  ;;  %v3410_v25 = vor.u32 %v4608_v8, %v3407_v9  ;;  %v3962_v29 = vor.u32 %v4746_v12, %v3959_v13  ;;  %v4692_v31 = vld [vmem:[#allocation5 + $0x424] sm:$0xf]  ;;  %p5173_p9 = scmp.lt.s32.totalorder %s5171_s7, %s5167_s27 }
  0x6f   : > { %2157 = vmatpush.bf16.msrb.mxu2 %v3314_v26  ;;  %v4343_v20 = vld [vmem:[#allocation5 + $0x8e8] sm:$0xf0]  ;;  %v320_v24 = vld [vmem:[%s5387_s10 + $0x50] sm:$0xff]  ;;  %v3770_v26 = vor.u32 %v4698_v10, %v3767_v11  ;;  %v3743_v32 = vld [vmem:[#allocation5 + $0x438] sm:$0xf0]  ;;  %p5169_p4 = pnand %p5168_p1, %p5353_p3 }
  0x70   : > { %2171 = vmatpush.bf16.msrb.mxu3 %v3506_v30  ;;  %v315_v27 = vld [vmem:[%s5387_s10 + $0x28] sm:$0xff]  ;;  %v4154_v30 = vor.u32 %v4794_v15, %v4151_v16  ;;  %v4740_v33 = vld [vmem:[#allocation5 + $0x5a4] sm:$0xf]  ;;  %v4346_v34 = vor.u32 %v4842_v17, %v4343_v20  ;;  %v5425_v35 = vpack.c.bf16 %v320_v24, %v314_v21  ;;  %v4319_v41 = vld [vmem:[#allocation5 + $0x8b8] sm:$0xf0]  ;;  %p5174_p2 = por %p5173_p9, %p5172_p11 }
  0x71   : > { %2130 = vmatpush.bf16.msrb.mxu0 %v4054_v36  ;;  %v3935_v36 = vld [vmem:[#allocation5 + $0x5b8] sm:$0xf0]  ;;  %v5427_v39 = vpack.c.bf16 %v321_v28, %v315_v27  ;;  %v4836_v40 = vld [vmem:[#allocation5 + $0x8a4] sm:$0xf]  ;;  %v4686_v45 = vld [vmem:[#allocation5 + $0x3f4] sm:$0xf]  ;;  %p5170_p8 = pneg %p5169_p4 }
  0x72   : > { %2144 = vmatpush.bf16.msrb.mxu1 %v4246_v37  ;;  %v4788_v37 = vld [vmem:[#allocation5 + $0x724] sm:$0xf]  ;;  %v3938_v43 = vor.u32 %v4740_v33, %v3935_v36  ;;  %v3719_v46 = vld [vmem:[#allocation5 + $0x408] sm:$0xf0]  ;;  %v4734_v47 = vld [vmem:[#allocation5 + $0x574] sm:$0xf] }
  0x73   : > { %2158 = vmatpush.bf16.msrb.mxu2 %v3290_v38  ;;  %v4127_v38 = vld [vmem:[#allocation5 + $0x738] sm:$0xf0]  ;;  %v4103_v51 = vld [vmem:[#allocation5 + $0x708] sm:$0xf0]  ;;  %v4830_v52 = vld [vmem:[#allocation5 + $0x874] sm:$0xf]  ;;  %p5175_p10 = pnand %p5174_p2, %p5170_p8 }
  0x74   : > { %2172 = vmatpush.bf16.msrb.mxu3 %v3482_v42  ;;  %v3746_v42 = vor.u32 %v4692_v31, %v3743_v32  ;;  %v4130_v44 = vor.u32 %v4788_v37, %v4127_v38  ;;  %v4295_v53 = vld [vmem:[#allocation5 + $0x888] sm:$0xf0]  ;;  %v4680_v58 = vld [vmem:[#allocation5 + $0x3c4] sm:$0xf]  ;;  %v3695_v59 = vld [vmem:[#allocation5 + $0x3d8] sm:$0xf0] }
  0x75   : > { %2131 = vmatpush.bf16.msrb.mxu0 %v4030_v48  ;;  %v4322_v48 = vor.u32 %v4836_v40, %v4319_v41  ;;  %v4728_v60 = vld [vmem:[#allocation5 + $0x544] sm:$0xf]  ;;  %v3887_v62 = vld [vmem:[#allocation5 + $0x558] sm:$0xf0]  ;;  %v3698_v3 = vor.u32 %v4680_v58, %v3695_v59  ;;  %v3671_v8 = vld [vmem:[#allocation5 + $0x3a8] sm:$0xf0] }
  0x76   : > { %2145 = vmatpush.bf16.msrb.mxu1 %v4222_v49  ;;  %v3911_v49 = vld [vmem:[#allocation5 + $0x588] sm:$0xf0]  ;;  %v4776_v63 = vld [vmem:[#allocation5 + $0x6c4] sm:$0xf]  ;;  %v4079_v0 = vld [vmem:[#allocation5 + $0x6d8] sm:$0xf0]  ;;  %v3890_v4 = vor.u32 %v4728_v60, %v3887_v62 }
  0x77   : > { %2159 = vmatpush.bf16.msrb.mxu2 %v3266_v50  ;;  %v4782_v50 = vld [vmem:[#allocation5 + $0x6f4] sm:$0xf]  ;;  %v3914_v55 = vor.u32 %v4734_v47, %v3911_v49  ;;  %v4082_v5 = vor.u32 %v4776_v63, %v4079_v0  ;;  %v3863_v11 = vld [vmem:[#allocation5 + $0x528] sm:$0xf0]  ;;  %v3647_v20 = vld [vmem:[#allocation5 + $0x378] sm:$0xf0] }
  0x78   : > { %2173 = vmatpush.bf16.msrb.mxu3 %v3458_v54  ;;  %v3722_v54 = vor.u32 %v4686_v45, %v3719_v46  ;;  %v4106_v56 = vor.u32 %v4782_v50, %v4103_v51  ;;  %v4722_v9 = vld [vmem:[#allocation5 + $0x514] sm:$0xf]  ;;  %v4055_v13 = vld [vmem:[#allocation5 + $0x6a8] sm:$0xf0]  ;;  %v4716_v21 = vld [vmem:[#allocation5 + $0x4e4] sm:$0xf] }
  0x79   : > { %2132 = vmatpush.bf16.msrb.mxu0 %v4006_v61  ;;  %v4298_v61 = vor.u32 %v4830_v52, %v4295_v53  ;;  %v4770_v12 = vld [vmem:[#allocation5 + $0x694] sm:$0xf]  ;;  %v4247_v15 = vld [vmem:[#allocation5 + $0x828] sm:$0xf0]  ;;  %v3866_v17 = vor.u32 %v4722_v9, %v3863_v11  ;;  %v4031_v27 = vld [vmem:[#allocation5 + $0x678] sm:$0xf0] }
  0x7a   : > { %2146 = vmatpush.bf16.msrb.mxu1 %v4198_v1  ;;  %v4824_v1 = vld [vmem:[#allocation5 + $0x844] sm:$0xf]  ;;  %v4662_v33 = vld [vmem:[#allocation5 + $0x334] sm:$0xf]  ;;  %v3815_v38 = vld [vmem:[#allocation5 + $0x4c8] sm:$0xf0] }
  0x7b   : > { %2160 = vmatpush.bf16.msrb.mxu2 %v3242_v2  ;;  %v4271_v2 = vld [vmem:[#allocation5 + $0x858] sm:$0xf0]  ;;  %v4812_v28 = vld [vmem:[#allocation5 + $0x7e4] sm:$0xf]  ;;  %v4710_v36 = vld [vmem:[#allocation5 + $0x4b4] sm:$0xf] }
  0x7c   : > { %2174 = vmatpush.bf16.msrb.mxu3 %v3434_v7  ;;  %v4674_v7 = vld [vmem:[#allocation5 + $0x394] sm:$0xf]  ;;  %v4274_v10 = vor.u32 %v4824_v1, %v4271_v2  ;;  %v4007_v41 = vld [vmem:[#allocation5 + $0x648] sm:$0xf0]  ;;  %v4656_v45 = vld [vmem:[#allocation5 + $0x304] sm:$0xf] }
  0x7d   : > { %2133 = vmatpush.bf16.msrb.mxu0 %v3982_v14  ;;  %v4818_v14 = vld [vmem:[#allocation5 + $0x814] sm:$0xf]  ;;  %v3674_v16 = vor.u32 %v4674_v7, %v3671_v8  ;;  %v3599_v46 = vld [vmem:[#allocation5 + $0x318] sm:$0xf0]  ;;  %v4704_v47 = vld [vmem:[#allocation5 + $0x484] sm:$0xf] }
  0x7e   : > { %2147 = vmatpush.bf16.msrb.mxu1 %v4174_v18  ;;  %v4058_v18 = vor.u32 %v4770_v12, %v4055_v13  ;;  %v4250_v24 = vor.u32 %v4818_v14, %v4247_v15  ;;  %v4758_v40 = vld [vmem:[#allocation5 + $0x634] sm:$0xf]  ;;  %v3791_v50 = vld [vmem:[#allocation5 + $0x498] sm:$0xf0]  ;;  %v4752_v51 = vld [vmem:[#allocation5 + $0x604] sm:$0xf]  ;;  %v3602_v60 = vor.u32 %v4656_v45, %v3599_v46 }
  0x7f   : > { %2161 = vmatpush.bf16.msrb.mxu2 %v3218_v19  ;;  %v4668_v19 = vld [vmem:[#allocation5 + $0x364] sm:$0xf]  ;;  %v4010_v49 = vor.u32 %v4758_v40, %v4007_v41  ;;  %v3983_v52 = vld [vmem:[#allocation5 + $0x618] sm:$0xf0]  ;;  %v4606_v58 = vld [vmem:[#allocation5 + $0x16c] sm:$0xf0]  ;;  %v3794_v0 = vor.u32 %v4704_v47, %v3791_v50 }
  0x80   : > { %2175 = vmatpush.bf16.msrb.mxu3 %v3410_v25  ;;  %2134 = vmatmul.bf16.vlgmr.msrb.gmra.mxu0 %v5425_v35  ;;  %v3839_v25 = vld [vmem:[#allocation5 + $0x4f8] sm:$0xf0]  ;;  %v3581_v59 = vld [vmem:[#allocation5 + $0x2d8] sm:$0xf]  ;;  %v4702_v63 = vld [vmem:[#allocation5 + $0x46c] sm:$0xf0]  ;;  %v3986_v1 = vor.u32 %v4752_v51, %v3983_v52 }
  0x81   : > { %2182 = vmatpush.bf16.msra.mxu0 %v3770_v26  ;;  %2148 = vmatmul.bf16.vlgmr.msrb.gmra.mxu1 %v5427_v39  ;;  %v4764_v26 = vld [vmem:[#allocation5 + $0x664] sm:$0xf]  ;;  %v3842_v31 = vor.u32 %v4716_v21, %v3839_v25  ;;  %v3773_v62 = vld [vmem:[#allocation5 + $0x458] sm:$0xf]  ;;  %v3365_v9 = vld [vmem:[#allocation5 + $0x128] sm:$0xf] }
  0x82   : > { %2196 = vmatpush.bf16.msra.mxu1 %v3962_v29  ;;  %2162 = vmatmul.bf16.vlgmr.msrb.gmra.mxu2 %v5403_v57  ;;  %v4223_v29 = vld [vmem:[#allocation5 + $0x7f8] sm:$0xf0]  ;;  %v4034_v32 = vor.u32 %v4764_v26, %v4031_v27  ;;  %v3965_v2 = vld [vmem:[#allocation5 + $0x5d8] sm:$0xf]  ;;  %v3774_v8 = vor.u32 %v4702_v63, %v3773_v62  ;;  %v3557_v11 = vld [vmem:[#allocation5 + $0x2a8] sm:$0xf] }
  0x83   : > { %2210 = vmatpush.bf16.msra.mxu2 %v4154_v30  ;;  %2176 = vmatmul.bf16.vlgmr.msrb.gmra.mxu3 %v5408_v6  ;;  %v3650_v30 = vor.u32 %v4668_v19, %v3647_v20  ;;  %v4226_v37 = vor.u32 %v4812_v28, %v4223_v29  ;;  %v4648_v13 = vld [vmem:[#allocation5 + $0x2bc] sm:$0xf0]  ;;  %v3749_v14 = vld [vmem:[#allocation5 + $0x428] sm:$0xf]  ;;  %v3341_v21 = vld [vmem:[#allocation5 + $0xf8] sm:$0xf] }
  0x84   : > { %2224 = vmatpush.bf16.msra.mxu3 %v4346_v34  ;;  %v3623_v34 = vld [vmem:[#allocation5 + $0x348] sm:$0xf0]  ;;  %v4696_v15 = vld [vmem:[#allocation5 + $0x43c] sm:$0xf0]  ;;  %v3558_v19 = vor.u32 %v4648_v13, %v3557_v11  ;;  %v3533_v25 = vld [vmem:[#allocation5 + $0x278] sm:$0xf] }
  0x85   : > { %2183 = vmatpush.bf16.msra.mxu0 %v3746_v42  ;;  %v4806_v42 = vld [vmem:[#allocation5 + $0x7b4] sm:$0xf]  ;;  %v3750_v20 = vor.u32 %v4696_v15, %v3749_v14  ;;  %v4642_v27 = vld [vmem:[#allocation5 + $0x28c] sm:$0xf0]  ;;  %v3725_v28 = vld [vmem:[#allocation5 + $0x3f8] sm:$0xf] }
  0x86   : > { %2197 = vmatpush.bf16.msra.mxu1 %v3938_v43  ;;  %v4199_v43 = vld [vmem:[#allocation5 + $0x7c8] sm:$0xf0]  ;;  %v4690_v29 = vld [vmem:[#allocation5 + $0x40c] sm:$0xf0]  ;;  %v4636_v41 = vld [vmem:[#allocation5 + $0x25c] sm:$0xf0] }
  0x87   : > { %2211 = vmatpush.bf16.msra.mxu2 %v4130_v44  ;;  %v3626_v44 = vor.u32 %v4662_v33, %v3623_v34  ;;  %v4202_v53 = vor.u32 %v4806_v42, %v4199_v43  ;;  %v3534_v33 = vor.u32 %v4642_v27, %v3533_v25  ;;  %v3726_v34 = vor.u32 %v4690_v29, %v3725_v28  ;;  %v3701_v42 = vld [vmem:[#allocation5 + $0x3c8] sm:$0xf]  ;;  %v4684_v43 = vld [vmem:[#allocation5 + $0x3dc] sm:$0xf0]  ;;  %v4582_v50 = vld [vmem:[#allocation5 + $0xac] sm:$0xf0] }
  0x88   : > { %2225 = vmatpush.bf16.msra.mxu3 %v4322_v48  ;;  %v3818_v48 = vor.u32 %v4710_v36, %v3815_v38  ;;  %v3317_v36 = vld [vmem:[#allocation5 + $0xc8] sm:$0xf]  ;;  %v4732_v45 = vld [vmem:[#allocation5 + $0x55c] sm:$0xf0]  ;;  %v3485_v51 = vld [vmem:[#allocation5 + $0x218] sm:$0xf] }
  0x89   : > { %2184 = vmatpush.bf16.msra.mxu0 %v3722_v54  ;;  %v4800_v54 = vld [vmem:[#allocation5 + $0x784] sm:$0xf]  ;;  %v3509_v38 = vld [vmem:[#allocation5 + $0x248] sm:$0xf]  ;;  %v4576_v63 = vld [vmem:[#allocation5 + $0x7c] sm:$0xf0] }
  0x8a   : > { %2198 = vmatpush.bf16.msra.mxu1 %v3914_v55  ;;  %v4175_v55 = vld [vmem:[#allocation5 + $0x798] sm:$0xf0]  ;;  %v3510_v47 = vor.u32 %v4636_v41, %v3509_v38  ;;  %v3269_v62 = vld [vmem:[#allocation5 + $0x68] sm:$0xf]  ;;  %v3245_v11 = vld [vmem:[#allocation5 + $0x38] sm:$0xf] }
  0x8b   : > { %2212 = vmatpush.bf16.msra.mxu2 %v4106_v56  ;;  %v3389_v56 = vld [vmem:[#allocation5 + $0x158] sm:$0xf]  ;;  %v4618_v15 = vld [vmem:[#allocation5 + $0x1cc] sm:$0xf0]  ;;  %v3413_v27 = vld [vmem:[#allocation5 + $0x188] sm:$0xf] }
  0x8c   : > { %2226 = vmatpush.bf16.msra.mxu3 %v4298_v61  ;;  %v4654_v61 = vld [vmem:[#allocation5 + $0x2ec] sm:$0xf0]  ;;  %v3437_v13 = vld [vmem:[#allocation5 + $0x1b8] sm:$0xf]  ;;  %v4612_v28 = vld [vmem:[#allocation5 + $0x19c] sm:$0xf0] }
  0x8d   : > { %2185 = vmatpush.bf16.msra.mxu0 %v3698_v3  ;;  %v4750_v3 = vld [vmem:[#allocation5 + $0x5ec] sm:$0xf0]  ;;  %v3582_v7 = vor.u32 %v4654_v61, %v3581_v59  ;;  %v3438_v25 = vor.u32 %v4618_v15, %v3437_v13  ;;  %v3605_v29 = vld [vmem:[#allocation5 + $0x308] sm:$0xf]  ;;  %v4603_v41 = vld [vmem:[#allocation5 + $0x15c] sm:$0xf] }
  0x8e   : > { %2199 = vmatpush.bf16.msra.mxu1 %v3890_v4  ;;  %v4178_v4 = vor.u32 %v4800_v54, %v4175_v55  ;;  %v3966_v12 = vor.u32 %v4750_v3, %v3965_v2  ;;  %v3677_v54 = vld [vmem:[#allocation5 + $0x398] sm:$0xf]  ;;  %v4678_v55 = vld [vmem:[#allocation5 + $0x3ac] sm:$0xf0]  ;;  %v4624_v2 = vld [vmem:[#allocation5 + $0x1fc] sm:$0xf0] }
  0x8f   : > { %2213 = vmatpush.bf16.msra.mxu2 %v4082_v5  ;;  %v3390_v5 = vor.u32 %v4606_v58, %v3389_v56  ;;  %v3869_v56 = vld [vmem:[#allocation5 + $0x518] sm:$0xf]  ;;  %v4726_v58 = vld [vmem:[#allocation5 + $0x52c] sm:$0xf0]  ;;  %v3678_v61 = vor.u32 %v4678_v55, %v3677_v54  ;;  %v3653_v3 = vld [vmem:[#allocation5 + $0x368] sm:$0xf] }
  0x90   : > { %2227 = vmatpush.bf16.msra.mxu3 %v4274_v10  ;;  %v4600_v10 = vld [vmem:[#allocation5 + $0x13c] sm:$0xf0]  ;;  %v4085_v13 = vld [vmem:[#allocation5 + $0x6c8] sm:$0xf] }
  0x91   : > { %2186 = vmatpush.bf16.msra.mxu0 %v3674_v16  ;;  %v3941_v16 = vld [vmem:[#allocation5 + $0x5a8] sm:$0xf]  ;;  %v4840_v55 = vld [vmem:[#allocation5 + $0x8bc] sm:$0xf0] }
  0x92   : > { %2200 = vmatpush.bf16.msra.mxu1 %v3866_v17  ;;  %v4744_v17 = vld [vmem:[#allocation5 + $0x5bc] sm:$0xf0]  ;;  %v4277_v15 = vld [vmem:[#allocation5 + $0x848] sm:$0xf] }
  0x93   : > { %2214 = vmatpush.bf16.msra.mxu2 %v4058_v18  ;;  %v3366_v18 = vor.u32 %v4600_v10, %v3365_v9  ;;  %v3942_v26 = vor.u32 %v4744_v17, %v3941_v16  ;;  %v3629_v16 = vld [vmem:[#allocation5 + $0x338] sm:$0xf]  ;;  %v4666_v17 = vld [vmem:[#allocation5 + $0x34c] sm:$0xf0] }
  0x94   : > { %2228 = vmatpush.bf16.msra.mxu3 %v4250_v24  ;;  %v4594_v24 = vld [vmem:[#allocation5 + $0x10c] sm:$0xf0] }
  0x95   : > { %2187 = vmatpush.bf16.msra.mxu0 %v3650_v30  ;;  %v3917_v30 = vld [vmem:[#allocation5 + $0x578] sm:$0xf] }
  0x96   : > { %2201 = vmatpush.bf16.msra.mxu1 %v3842_v31  ;;  %v4738_v31 = vld [vmem:[#allocation5 + $0x58c] sm:$0xf0] }
  0x97   : > { %2215 = vmatpush.bf16.msra.mxu2 %v4034_v32  ;;  %v3342_v32 = vor.u32 %v4594_v24, %v3341_v21  ;;  %v3918_v40 = vor.u32 %v4738_v31, %v3917_v30  ;;  %v3221_v21 = vld [vmem:[#allocation5 + $0x8] sm:$0xf]  ;;  %v4564_v24 = vld [vmem:[#allocation5 + $0x1c] sm:$0xf0] }
  0x98   : > { %2229 = vmatpush.bf16.msra.mxu3 %v4226_v37  ;;  %v4588_v37 = vld [vmem:[#allocation5 + $0xdc] sm:$0xf0]  ;;  %v3222_v38 = vor.u32 %v4564_v24, %v3221_v21  ;;  %v3511_v21 = vld [vmem:[#allocation5 + $0x260] sm:$0xf0] }
  0x99   : > { %2188 = vmatpush.bf16.msra.mxu0 %v3626_v44  ;;  %v3893_v44 = vld [vmem:[#allocation5 + $0x548] sm:$0xf]  ;;  %v3318_v46 = vor.u32 %v4588_v37, %v3317_v36  ;;  %v4660_v31 = vld [vmem:[#allocation5 + $0x31c] sm:$0xf0]  ;;  %v4798_v36 = vld [vmem:[#allocation5 + $0x76c] sm:$0xf0] }
  0x9a   : > { %2202 = vmatpush.bf16.msra.mxu1 %v3818_v48  ;;  %v3702_v48 = vor.u32 %v4684_v43, %v3701_v42  ;;  %v3894_v52 = vor.u32 %v4732_v45, %v3893_v44  ;;  %v4349_v37 = vld [vmem:[#allocation5 + $0x8d8] sm:$0xf]  ;;  %v3391_v42 = vld [vmem:[#allocation5 + $0x170] sm:$0xf0]  ;;  %v3414_v43 = vor.u32 %v4612_v28, %v3413_v27  ;;  %v3606_v44 = vor.u32 %v4660_v31, %v3605_v29  ;;  %v4651_v45 = vld [vmem:[#allocation5 + $0x2dc] sm:$0xf] }
  0x9b   : > { %2216 = vmatpush.bf16.msra.mxu2 %v4010_v49  ;;  %v3293_v49 = vld [vmem:[#allocation5 + $0x98] sm:$0xf]  ;;  %v4774_v28 = vld [vmem:[#allocation5 + $0x6ac] sm:$0xf0] }
  0x9c   : > { %2230 = vmatpush.bf16.msra.mxu3 %v4202_v53  ;;  %v4630_v53 = vld [vmem:[#allocation5 + $0x22c] sm:$0xf0]  ;;  %v3294_v59 = vor.u32 %v4582_v50, %v3293_v49  ;;  %v3394_v50 = vor.u32 %v4603_v41, %v3391_v42  ;;  %v4061_v27 = vld [vmem:[#allocation5 + $0x698] sm:$0xf]  ;;  %v4037_v41 = vld [vmem:[#allocation5 + $0x668] sm:$0xf] }
  0x9d   : > { %2189 = vmatpush.bf16.msra.mxu0 %v3602_v60  ;;  %v3486_v60 = vor.u32 %v4630_v53, %v3485_v51  ;;  %v4133_v51 = vld [vmem:[#allocation5 + $0x728] sm:$0xf]  ;;  %v4253_v29 = vld [vmem:[#allocation5 + $0x818] sm:$0xf]  ;;  %v4822_v31 = vld [vmem:[#allocation5 + $0x82c] sm:$0xf0] }
  0x9e   : > { %2203 = vmatpush.bf16.msra.mxu1 %v3794_v0  ;;  %v3461_v0 = vld [vmem:[#allocation5 + $0x1e8] sm:$0xf]  ;;  %v4768_v42 = vld [vmem:[#allocation5 + $0x67c] sm:$0xf0] }
  0x9f   : > { %2217 = vmatpush.bf16.msra.mxu2 %v3986_v1  ;;  %v3870_v1 = vor.u32 %v4726_v58, %v3869_v56  ;;  %v3462_v9 = vor.u32 %v4624_v2, %v3461_v0  ;;  %v4325_v53 = vld [vmem:[#allocation5 + $0x8a8] sm:$0xf]  ;;  %v4597_v56 = vld [vmem:[#allocation5 + $0x12c] sm:$0xf]  ;;  %v3367_v58 = vld [vmem:[#allocation5 + $0x140] sm:$0xf0] }
  0xa0   : > { %2231 = vmatpush.bf16.msra.mxu3 %v4178_v4  ;;  %2190 = vmatmul.bf16.vlgmr.msra.gmra.mxu0 %v5415_v22  ;;  %v4672_v4 = vld [vmem:[#allocation5 + $0x37c] sm:$0xf0]  ;;  %v4109_v0 = vld [vmem:[#allocation5 + $0x6f8] sm:$0xf] }
  0xa1   : > { %2238 = vmatpush.bf16.msrb.mxu0 %v3390_v5  ;;  %2204 = vmatmul.bf16.vlgmr.msra.gmra.mxu1 %v5417_v23  ;;  %v3845_v5 = vld [vmem:[#allocation5 + $0x4e8] sm:$0xf]  ;;  %v3654_v10 = vor.u32 %v4672_v4, %v3653_v3  ;;  %v4301_v2 = vld [vmem:[#allocation5 + $0x878] sm:$0xf]  ;;  %v4834_v4 = vld [vmem:[#allocation5 + $0x88c] sm:$0xf0] }
  0xa2   : > { %2252 = vmatpush.bf16.msrb.mxu1 %v3582_v7  ;;  %2218 = vmatmul.bf16.vlgmr.msra.gmra.mxu2 %v5425_v35  ;;  %v4720_v7 = vld [vmem:[#allocation5 + $0x4fc] sm:$0xf0] }
  0xa3   : > { %2266 = vmatpush.bf16.msrb.mxu2 %v3774_v8  ;;  %2232 = vmatmul.bf16.vlgmr.msra.gmra.mxu3 %v5427_v39  ;;  %v3270_v8 = vor.u32 %v4576_v63, %v3269_v62  ;;  %v3846_v14 = vor.u32 %v4720_v7, %v3845_v5  ;;  %v4326_v62 = vor.u32 %v4840_v55, %v4325_v53  ;;  %v4591_v5 = vld [vmem:[#allocation5 + $0xfc] sm:$0xf]  ;;  %v3343_v7 = vld [vmem:[#allocation5 + $0x110] sm:$0xf0]  ;;  %v4013_v53 = vld [vmem:[#allocation5 + $0x638] sm:$0xf] }
  0xa4   : > { %2280 = vmatpush.bf16.msrb.mxu3 %v3966_v12  ;;  %v4570_v12 = vld [vmem:[#allocation5 + $0x4c] sm:$0xf0]  ;;  %v3370_v63 = vor.u32 %v4597_v56, %v3367_v58  ;;  %v4205_v55 = vld [vmem:[#allocation5 + $0x7b8] sm:$0xf] }
  0xa5   : > { %2239 = vmatpush.bf16.msrb.mxu0 %v3366_v18  ;;  %v3821_v18 = vld [vmem:[#allocation5 + $0x4b8] sm:$0xf]  ;;  %v4810_v58 = vld [vmem:[#allocation5 + $0x7cc] sm:$0xf0] }
  0xa6   : > { %2253 = vmatpush.bf16.msrb.mxu1 %v3558_v19  ;;  %v4714_v19 = vld [vmem:[#allocation5 + $0x4cc] sm:$0xf0] }
  0xa7   : > { %2267 = vmatpush.bf16.msrb.mxu2 %v3750_v20  ;;  %v3246_v20 = vor.u32 %v4570_v12, %v3245_v11  ;;  %v3822_v30 = vor.u32 %v4714_v19, %v3821_v18  ;;  %v4302_v11 = vor.u32 %v4834_v4, %v4301_v2  ;;  %v3346_v12 = vor.u32 %v4591_v5, %v3343_v7  ;;  %v4585_v18 = vld [vmem:[#allocation5 + $0xcc] sm:$0xf]  ;;  %v3319_v19 = vld [vmem:[#allocation5 + $0xe0] sm:$0xf0]  ;;  %v4181_v4 = vld [vmem:[#allocation5 + $0x788] sm:$0xf] }
  0xa8   : > { %2281 = vmatpush.bf16.msrb.mxu3 %v3942_v26  ;;  %v3630_v26 = vor.u32 %v4666_v17, %v3629_v16  ;;  %v4828_v17 = vld [vmem:[#allocation5 + $0x85c] sm:$0xf0]  ;;  %v4206_v2 = vor.u32 %v4810_v58, %v4205_v55  ;;  %v4561_v7 = vld [vmem:[#allocation5 + $0xc] sm:$0xf] }
  0xa9   : > { %2240 = vmatpush.bf16.msrb.mxu0 %v3342_v32  ;;  %v3797_v32 = vld [vmem:[#allocation5 + $0x488] sm:$0xf]  ;;  %v4804_v5 = vld [vmem:[#allocation5 + $0x79c] sm:$0xf0]  ;;  %v4681_v55 = vld [vmem:[#allocation5 + $0x3cc] sm:$0xf] }
  0xaa   : > { %2254 = vmatpush.bf16.msrb.mxu1 %v3534_v33  ;;  %v4708_v33 = vld [vmem:[#allocation5 + $0x49c] sm:$0xf0]  ;;  %v4729_v58 = vld [vmem:[#allocation5 + $0x54c] sm:$0xf] }
  0xab   : > { %2268 = vmatpush.bf16.msrb.mxu2 %v3726_v34  ;;  %v4157_v34 = vld [vmem:[#allocation5 + $0x758] sm:$0xf] }
  0xac   : > { %2282 = vmatpush.bf16.msrb.mxu3 %v3918_v40  ;;  %v4846_v40 = vld [vmem:[#allocation5 + $0x8ec] sm:$0xf0] }
  0xad   : > { %2241 = vmatpush.bf16.msrb.mxu0 %v3318_v46  ;;  %v3583_v46 = vld [vmem:[#allocation5 + $0x2f0] sm:$0xf0]  ;;  %v4350_v49 = vor.u32 %v4846_v40, %v4349_v37  ;;  %v4062_v37 = vor.u32 %v4774_v28, %v4061_v27 }
  0xae   : > { %2255 = vmatpush.bf16.msrb.mxu1 %v3510_v47  ;;  %v3798_v47 = vor.u32 %v4708_v33, %v3797_v32  ;;  %v3586_v54 = vor.u32 %v4651_v45, %v3583_v46  ;;  %v4579_v32 = vld [vmem:[#allocation5 + $0x9c] sm:$0xf]  ;;  %v3295_v33 = vld [vmem:[#allocation5 + $0xb0] sm:$0xf0]  ;;  %v4816_v45 = vld [vmem:[#allocation5 + $0x7fc] sm:$0xf0] }
  0xaf   : > { %2269 = vmatpush.bf16.msrb.mxu2 %v3702_v48  ;;  %v4158_v48 = vor.u32 %v4798_v36, %v4157_v34  ;;  %v4627_v34 = vld [vmem:[#allocation5 + $0x21c] sm:$0xf]  ;;  %v3487_v36 = vld [vmem:[#allocation5 + $0x230] sm:$0xf0]  ;;  %v3298_v40 = vor.u32 %v4579_v32, %v3295_v33  ;;  %v4573_v46 = vld [vmem:[#allocation5 + $0x6c] sm:$0xf] }
  0xb0   : > { %2283 = vmatpush.bf16.msrb.mxu3 %v3894_v52  ;;  %v4792_v52 = vld [vmem:[#allocation5 + $0x73c] sm:$0xf0]  ;;  %v3943_v33 = vld [vmem:[#allocation5 + $0x5c0] sm:$0xf0] }
  0xb1   : > { %2242 = vmatpush.bf16.msrb.mxu0 %v3294_v59  ;;  %v4645_v59 = vld [vmem:[#allocation5 + $0x2ac] sm:$0xf] }
  0xb2   : > { %2256 = vmatpush.bf16.msrb.mxu1 %v3486_v60  ;;  %v3559_v60 = vld [vmem:[#allocation5 + $0x2c0] sm:$0xf0] }
  0xb3   : > { %2270 = vmatpush.bf16.msrb.mxu2 %v3678_v61  ;;  %v4134_v61 = vor.u32 %v4792_v52, %v4133_v51  ;;  %v3562_v3 = vor.u32 %v4645_v59, %v3559_v60  ;;  %v4567_v59 = vld [vmem:[#allocation5 + $0x3c] sm:$0xf]  ;;  %v3247_v60 = vld [vmem:[#allocation5 + $0x50] sm:$0xf0] }
  0xb4   : > { %2284 = vmatpush.bf16.msrb.mxu3 %v3870_v1  ;;  %v4786_v1 = vld [vmem:[#allocation5 + $0x70c] sm:$0xf0] }
  0xb5   : > { %2243 = vmatpush.bf16.msrb.mxu0 %v3270_v8  ;;  %v4639_v8 = vld [vmem:[#allocation5 + $0x27c] sm:$0xf] }
  0xb6   : > { %2257 = vmatpush.bf16.msrb.mxu1 %v3462_v9  ;;  %v3535_v9 = vld [vmem:[#allocation5 + $0x290] sm:$0xf0] }
  0xb7   : > { %2271 = vmatpush.bf16.msrb.mxu2 %v3654_v10  ;;  %v4110_v10 = vor.u32 %v4786_v1, %v4109_v0  ;;  %v3538_v16 = vor.u32 %v4639_v8, %v3535_v9  ;;  %v3989_v0 = vld [vmem:[#allocation5 + $0x608] sm:$0xf]  ;;  %v4756_v1 = vld [vmem:[#allocation5 + $0x61c] sm:$0xf0]  ;;  %v3223_v9 = vld [vmem:[#allocation5 + $0x20] sm:$0xf0] }
  0xb8   : > { %2285 = vmatpush.bf16.msrb.mxu3 %v3846_v14  ;;  %v4780_v14 = vld [vmem:[#allocation5 + $0x6dc] sm:$0xf0] }
  0xb9   : > { %2244 = vmatpush.bf16.msrb.mxu0 %v3246_v20  ;;  %v4633_v20 = vld [vmem:[#allocation5 + $0x24c] sm:$0xf]  ;;  %v4086_v24 = vor.u32 %v4780_v14, %v4085_v13  ;;  %v3775_v13 = vld [vmem:[#allocation5 + $0x470] sm:$0xf0]  ;;  %v4747_v14 = vld [vmem:[#allocation5 + $0x5dc] sm:$0xf] }
  0xba   : > { %2258 = vmatpush.bf16.msrb.mxu1 %v3438_v25  ;;  %v4278_v25 = vor.u32 %v4828_v17, %v4277_v15  ;;  %v3990_v15 = vor.u32 %v4756_v1, %v3989_v0  ;;  %v4795_v17 = vld [vmem:[#allocation5 + $0x75c] sm:$0xf]  ;;  %v4279_v0 = vld [vmem:[#allocation5 + $0x860] sm:$0xf0] }
  0xbb   : > { %2272 = vmatpush.bf16.msrb.mxu2 %v3630_v26  ;;  %v3322_v26 = vor.u32 %v4585_v18, %v3319_v19  ;;  %v4159_v18 = vld [vmem:[#allocation5 + $0x770] sm:$0xf0]  ;;  %v4182_v19 = vor.u32 %v4804_v5, %v4181_v4  ;;  %v4675_v4 = vld [vmem:[#allocation5 + $0x39c] sm:$0xf] }
  0xbc   : > { %2286 = vmatpush.bf16.msrb.mxu3 %v3822_v30  ;;  %v3514_v30 = vor.u32 %v4633_v20, %v3511_v21  ;;  %v3226_v20 = vor.u32 %v4561_v7, %v3223_v9  ;;  %v4843_v21 = vld [vmem:[#allocation5 + $0x8dc] sm:$0xf]  ;;  %v4162_v28 = vor.u32 %v4795_v17, %v4159_v18  ;;  %v3679_v5 = vld [vmem:[#allocation5 + $0x3b0] sm:$0xf0]  ;;  %v4669_v17 = vld [vmem:[#allocation5 + $0x36c] sm:$0xf] }
  0xbd   : > { %2245 = vmatpush.bf16.msrb.mxu0 %v3222_v38  ;;  %v4254_v38 = vor.u32 %v4822_v31, %v4253_v29  ;;  %v4693_v29 = vld [vmem:[#allocation5 + $0x42c] sm:$0xf]  ;;  %v4723_v7 = vld [vmem:[#allocation5 + $0x51c] sm:$0xf]  ;;  %v3871_v9 = vld [vmem:[#allocation5 + $0x530] sm:$0xf0] }
  0xbe   : > { %2259 = vmatpush.bf16.msrb.mxu1 %v3414_v43  ;;  %v4229_v43 = vld [vmem:[#allocation5 + $0x7e8] sm:$0xf]  ;;  %v4741_v31 = vld [vmem:[#allocation5 + $0x5ac] sm:$0xf]  ;;  %v3655_v18 = vld [vmem:[#allocation5 + $0x380] sm:$0xf0] }
  0xbf   : > { %2273 = vmatpush.bf16.msrb.mxu2 %v3606_v44  ;;  %v3490_v44 = vor.u32 %v4627_v34, %v3487_v36  ;;  %v4230_v51 = vor.u32 %v4816_v45, %v4229_v43  ;;  %v4789_v34 = vld [vmem:[#allocation5 + $0x72c] sm:$0xf]  ;;  %v4135_v36 = vld [vmem:[#allocation5 + $0x740] sm:$0xf0]  ;;  %v4687_v43 = vld [vmem:[#allocation5 + $0x3fc] sm:$0xf] }
  0xc0   : > { %2287 = vmatpush.bf16.msrb.mxu3 %v3798_v47  ;;  %2246 = vmatmul.bf16.vlgmr.msrb.gmra.mxu0 %v5403_v57  ;;  %v3271_v47 = vld [vmem:[#allocation5 + $0x80] sm:$0xf0]  ;;  %v4735_v45 = vld [vmem:[#allocation5 + $0x57c] sm:$0xf] }
  0xc1   : > { %2294 = vmatpush.bf16.msra.mxu0 %v4158_v48  ;;  %2260 = vmatmul.bf16.vlgmr.msrb.gmra.mxu1 %v5408_v6  ;;  %v4621_v48 = vld [vmem:[#allocation5 + $0x1ec] sm:$0xf]  ;;  %v3274_v52 = vor.u32 %v4573_v46, %v3271_v47  ;;  %v3919_v47 = vld [vmem:[#allocation5 + $0x590] sm:$0xf0] }
  0xc2   : > { %2308 = vmatpush.bf16.msra.mxu1 %v4350_v49  ;;  %2274 = vmatmul.bf16.vlgmr.msrb.gmra.mxu2 %v5415_v22  ;;  %v3463_v49 = vld [vmem:[#allocation5 + $0x200] sm:$0xf0] }
  0xc3   : > { %2322 = vmatpush.bf16.msra.mxu2 %v3394_v50  ;;  %2288 = vmatmul.bf16.vlgmr.msrb.gmra.mxu3 %v5417_v23  ;;  %v4038_v50 = vor.u32 %v4768_v42, %v4037_v41  ;;  %v3466_v56 = vor.u32 %v4621_v48, %v3463_v49  ;;  %v3946_v41 = vor.u32 %v4741_v31, %v3943_v33  ;;  %v4783_v48 = vld [vmem:[#allocation5 + $0x6fc] sm:$0xf]  ;;  %v4111_v49 = vld [vmem:[#allocation5 + $0x710] sm:$0xf0] }
  0xc4   : > { %2336 = vmatpush.bf16.msra.mxu3 %v3586_v54  ;;  %v4762_v54 = vld [vmem:[#allocation5 + $0x64c] sm:$0xf0]  ;;  %v4138_v42 = vor.u32 %v4789_v34, %v4135_v36  ;;  %v4663_v31 = vld [vmem:[#allocation5 + $0x33c] sm:$0xf]  ;;  %v3823_v36 = vld [vmem:[#allocation5 + $0x4d0] sm:$0xf0] }
  0xc5   : > { %2295 = vmatpush.bf16.msra.mxu0 %v4134_v61  ;;  %v4615_v61 = vld [vmem:[#allocation5 + $0x1bc] sm:$0xf] }
  0xc6   : > { %2309 = vmatpush.bf16.msra.mxu1 %v4326_v62  ;;  %v3439_v62 = vld [vmem:[#allocation5 + $0x1d0] sm:$0xf0]  ;;  %v4711_v33 = vld [vmem:[#allocation5 + $0x4bc] sm:$0xf] }
  0xc7   : > { %2323 = vmatpush.bf16.msra.mxu2 %v3370_v63  ;;  %v4014_v63 = vor.u32 %v4762_v54, %v4013_v53  ;;  %v3442_v8 = vor.u32 %v4615_v61, %v3439_v62  ;;  %v3922_v53 = vor.u32 %v4735_v45, %v3919_v47  ;;  %v4114_v54 = vor.u32 %v4783_v48, %v4111_v49  ;;  %v4777_v61 = vld [vmem:[#allocation5 + $0x6cc] sm:$0xf]  ;;  %v4087_v62 = vld [vmem:[#allocation5 + $0x6e0] sm:$0xf0] }
  0xc8   : > { %2337 = vmatpush.bf16.msra.mxu3 %v3562_v3  ;;  %v3250_v3 = vor.u32 %v4567_v59, %v3247_v60  ;;  %v3895_v60 = vld [vmem:[#allocation5 + $0x560] sm:$0xf0]  ;;  %v3826_v45 = vor.u32 %v4711_v33, %v3823_v36  ;;  %v4705_v47 = vld [vmem:[#allocation5 + $0x48c] sm:$0xf]  ;;  %v3325_v33 = vld [vmem:[#allocation5 + $0xd0] sm:$0xf] }
  0xc9   : > { %2296 = vmatpush.bf16.msra.mxu0 %v4110_v10  ;;  %v4609_v10 = vld [vmem:[#allocation5 + $0x18c] sm:$0xf]  ;;  %v3799_v48 = vld [vmem:[#allocation5 + $0x4a0] sm:$0xf0]  ;;  %v3517_v36 = vld [vmem:[#allocation5 + $0x250] sm:$0xf] }
  0xca   : > { %2310 = vmatpush.bf16.msra.mxu1 %v4302_v11  ;;  %v3415_v11 = vld [vmem:[#allocation5 + $0x1a0] sm:$0xf0]  ;;  %v4753_v49 = vld [vmem:[#allocation5 + $0x60c] sm:$0xf] }
  0xcb   : > { %2324 = vmatpush.bf16.msra.mxu2 %v3346_v12  ;;  %v4699_v12 = vld [vmem:[#allocation5 + $0x45c] sm:$0xf] }
  0xcc   : > { %2338 = vmatpush.bf16.msra.mxu3 %v3538_v16  ;;  %v3967_v16 = vld [vmem:[#allocation5 + $0x5f0] sm:$0xf0] }
  0xcd   : > { %2297 = vmatpush.bf16.msra.mxu0 %v4086_v24  ;;  %v4351_v24 = vld [vmem:[#allocation5 + $0x8f0] sm:$0xf0]  ;;  %v3970_v27 = vor.u32 %v4747_v14, %v3967_v16  ;;  %v3682_v14 = vor.u32 %v4675_v4, %v3679_v5 }
  0xce   : > { %2311 = vmatpush.bf16.msra.mxu1 %v4278_v25  ;;  %v3418_v25 = vor.u32 %v4609_v10, %v3415_v11  ;;  %v4354_v32 = vor.u32 %v4843_v21, %v4351_v24  ;;  %v4771_v10 = vld [vmem:[#allocation5 + $0x69c] sm:$0xf]  ;;  %v4063_v11 = vld [vmem:[#allocation5 + $0x6b0] sm:$0xf0]  ;;  %v3847_v21 = vld [vmem:[#allocation5 + $0x500] sm:$0xf0] }
  0xcf   : > { %2325 = vmatpush.bf16.msra.mxu2 %v3322_v26  ;;  %v3778_v26 = vor.u32 %v4699_v12, %v3775_v13  ;;  %v4819_v12 = vld [vmem:[#allocation5 + $0x81c] sm:$0xf]  ;;  %v4255_v13 = vld [vmem:[#allocation5 + $0x830] sm:$0xf0]  ;;  %v4066_v16 = vor.u32 %v4771_v10, %v4063_v11  ;;  %v4765_v24 = vld [vmem:[#allocation5 + $0x66c] sm:$0xf] }
  0xd0   : > { %2339 = vmatpush.bf16.msra.mxu3 %v3514_v30  ;;  %v3751_v30 = vld [vmem:[#allocation5 + $0x440] sm:$0xf0]  ;;  %v4649_v11 = vld [vmem:[#allocation5 + $0x2c4] sm:$0xf0] }
  0xd1   : > { %2298 = vmatpush.bf16.msra.mxu0 %v4062_v37  ;;  %v4837_v37 = vld [vmem:[#allocation5 + $0x8ac] sm:$0xf] }
  0xd2   : > { %2312 = vmatpush.bf16.msra.mxu1 %v4254_v38  ;;  %v4327_v38 = vld [vmem:[#allocation5 + $0x8c0] sm:$0xf0] }
  0xd3   : > { %2326 = vmatpush.bf16.msra.mxu2 %v3298_v40  ;;  %v3754_v40 = vor.u32 %v4693_v29, %v3751_v30  ;;  %v4330_v46 = vor.u32 %v4837_v37, %v4327_v38  ;;  %v4759_v37 = vld [vmem:[#allocation5 + $0x63c] sm:$0xf]  ;;  %v4015_v38 = vld [vmem:[#allocation5 + $0x650] sm:$0xf0] }
  0xd4   : > { %2340 = vmatpush.bf16.msra.mxu3 %v3490_v44  ;;  %v3727_v44 = vld [vmem:[#allocation5 + $0x410] sm:$0xf0] }
  0xd5   : > { %2299 = vmatpush.bf16.msra.mxu0 %v4038_v50  ;;  %v4831_v50 = vld [vmem:[#allocation5 + $0x87c] sm:$0xf] }
  0xd6   : > { %2313 = vmatpush.bf16.msra.mxu1 %v4230_v51  ;;  %v4303_v51 = vld [vmem:[#allocation5 + $0x890] sm:$0xf0] }
  0xd7   : > { %2327 = vmatpush.bf16.msra.mxu2 %v3274_v52  ;;  %v3730_v52 = vor.u32 %v4687_v43, %v3727_v44  ;;  %v4306_v59 = vor.u32 %v4831_v50, %v4303_v51  ;;  %v4657_v43 = vld [vmem:[#allocation5 + $0x30c] sm:$0xf]  ;;  %v3607_v44 = vld [vmem:[#allocation5 + $0x320] sm:$0xf0] }
  0xd8   : > { %2341 = vmatpush.bf16.msra.mxu3 %v3466_v56  ;;  %v3703_v56 = vld [vmem:[#allocation5 + $0x3e0] sm:$0xf0] }
  0xd9   : > { %2300 = vmatpush.bf16.msra.mxu0 %v4014_v63  ;;  %v4825_v63 = vld [vmem:[#allocation5 + $0x84c] sm:$0xf]  ;;  %v3706_v1 = vor.u32 %v4681_v55, %v3703_v56  ;;  %v3991_v51 = vld [vmem:[#allocation5 + $0x620] sm:$0xf0]  ;;  %v4607_v55 = vld [vmem:[#allocation5 + $0x174] sm:$0xf0] }
  0xda   : > { %2314 = vmatpush.bf16.msra.mxu1 %v4206_v2  ;;  %v3898_v2 = vor.u32 %v4729_v58, %v3895_v60  ;;  %v3589_v56 = vld [vmem:[#allocation5 + $0x2e0] sm:$0xf]  ;;  %v3610_v58 = vor.u32 %v4657_v43, %v3607_v44  ;;  %v4733_v43 = vld [vmem:[#allocation5 + $0x564] sm:$0xf0] }
  0xdb   : > { %2328 = vmatpush.bf16.msra.mxu2 %v3250_v3  ;;  %v4090_v3 = vor.u32 %v4777_v61, %v4087_v62  ;;  %v3781_v60 = vld [vmem:[#allocation5 + $0x460] sm:$0xf]  ;;  %v4703_v61 = vld [vmem:[#allocation5 + $0x474] sm:$0xf0]  ;;  %v3802_v62 = vor.u32 %v4705_v47, %v3799_v48 }
  0xdc   : > { %2342 = vmatpush.bf16.msra.mxu3 %v3442_v8  ;;  %v4282_v8 = vor.u32 %v4825_v63, %v4279_v0  ;;  %v3994_v63 = vor.u32 %v4753_v49, %v3991_v51  ;;  %v3973_v0 = vld [vmem:[#allocation5 + $0x5e0] sm:$0xf]  ;;  %v3782_v5 = vor.u32 %v4703_v61, %v3781_v60  ;;  %v4583_v48 = vld [vmem:[#allocation5 + $0xb4] sm:$0xf0]  ;;  %v3277_v60 = vld [vmem:[#allocation5 + $0x70] sm:$0xf] }
  0xdd   : > { %2301 = vmatpush.bf16.msra.mxu0 %v3990_v15  ;;  %v3874_v15 = vor.u32 %v4723_v7, %v3871_v9  ;;  %v3373_v7 = vld [vmem:[#allocation5 + $0x130] sm:$0xf]  ;;  %v3301_v47 = vld [vmem:[#allocation5 + $0xa0] sm:$0xf]  ;;  %v4631_v51 = vld [vmem:[#allocation5 + $0x234] sm:$0xf0] }
  0xde   : > { %2315 = vmatpush.bf16.msra.mxu1 %v4182_v19  ;;  %v4717_v19 = vld [vmem:[#allocation5 + $0x4ec] sm:$0xf]  ;;  %v3565_v9 = vld [vmem:[#allocation5 + $0x2b0] sm:$0xf]  ;;  %v3493_v49 = vld [vmem:[#allocation5 + $0x220] sm:$0xf] }
  0xdf   : > { %2329 = vmatpush.bf16.msra.mxu2 %v3226_v20  ;;  %v4258_v20 = vor.u32 %v4819_v12, %v4255_v13  ;;  %v3850_v29 = vor.u32 %v4717_v19, %v3847_v21  ;;  %v3757_v12 = vld [vmem:[#allocation5 + $0x430] sm:$0xf]  ;;  %v4697_v13 = vld [vmem:[#allocation5 + $0x444] sm:$0xf0]  ;;  %v3349_v19 = vld [vmem:[#allocation5 + $0x100] sm:$0xf] }
  0xe0   : > { %2343 = vmatpush.bf16.msra.mxu3 %v3418_v25  ;;  %2302 = vmatmul.bf16.vlgmr.msra.gmra.mxu0 %v5425_v35  ;;  %v4039_v25 = vld [vmem:[#allocation5 + $0x680] sm:$0xf0]  ;;  %v3541_v21 = vld [vmem:[#allocation5 + $0x280] sm:$0xf]  ;;  %v4577_v61 = vld [vmem:[#allocation5 + $0x84] sm:$0xf0] }
  0xe1   : > { %2350 = vmatpush.bf16.msrb.mxu0 %v3778_v26  ;;  %2316 = vmatmul.bf16.vlgmr.msra.gmra.mxu1 %v5427_v39  ;;  %v4813_v26 = vld [vmem:[#allocation5 + $0x7ec] sm:$0xf]  ;;  %v4042_v30 = vor.u32 %v4765_v24, %v4039_v25  ;;  %v4643_v25 = vld [vmem:[#allocation5 + $0x294] sm:$0xf0] }
  0xe2   : > { %2364 = vmatpush.bf16.msrb.mxu1 %v3970_v27  ;;  %2330 = vmatmul.bf16.vlgmr.msra.gmra.mxu2 %v5403_v57  ;;  %v4231_v27 = vld [vmem:[#allocation5 + $0x800] sm:$0xf0] }
  0xe3   : > { %2378 = vmatpush.bf16.msrb.mxu2 %v4162_v28  ;;  %2344 = vmatmul.bf16.vlgmr.msra.gmra.mxu3 %v5408_v6  ;;  %v3658_v28 = vor.u32 %v4669_v17, %v3655_v18  ;;  %v4234_v34 = vor.u32 %v4813_v26, %v4231_v27  ;;  %v3566_v17 = vor.u32 %v4649_v11, %v3565_v9  ;;  %v3733_v26 = vld [vmem:[#allocation5 + $0x400] sm:$0xf]  ;;  %v4691_v27 = vld [vmem:[#allocation5 + $0x414] sm:$0xf0] }
  0xe4   : > { %2392 = vmatpush.bf16.msrb.mxu3 %v4354_v32  ;;  %v3631_v32 = vld [vmem:[#allocation5 + $0x350] sm:$0xf0]  ;;  %v3758_v18 = vor.u32 %v4697_v13, %v3757_v12  ;;  %v3253_v9 = vld [vmem:[#allocation5 + $0x40] sm:$0xf]  ;;  %v4619_v13 = vld [vmem:[#allocation5 + $0x1d4] sm:$0xf0] }
  0xe5   : > { %2351 = vmatpush.bf16.msrb.mxu0 %v3754_v40  ;;  %v4807_v40 = vld [vmem:[#allocation5 + $0x7bc] sm:$0xf]  ;;  %v3445_v11 = vld [vmem:[#allocation5 + $0x1c0] sm:$0xf] }
  0xe6   : > { %2365 = vmatpush.bf16.msrb.mxu1 %v3946_v41  ;;  %v4207_v41 = vld [vmem:[#allocation5 + $0x7d0] sm:$0xf0] }
  0xe7   : > { %2379 = vmatpush.bf16.msrb.mxu2 %v4138_v42  ;;  %v3634_v42 = vor.u32 %v4663_v31, %v3631_v32  ;;  %v4210_v50 = vor.u32 %v4807_v40, %v4207_v41  ;;  %v3542_v31 = vor.u32 %v4643_v25, %v3541_v21  ;;  %v3734_v32 = vor.u32 %v4691_v27, %v3733_v26  ;;  %v3709_v40 = vld [vmem:[#allocation5 + $0x3d0] sm:$0xf]  ;;  %v4685_v41 = vld [vmem:[#allocation5 + $0x3e4] sm:$0xf0]  ;;  %v5449_v21 = vpop.f32.mrf.mxu0 }
  0xe8   : > { %2393 = vmatpush.bf16.msrb.mxu3 %v4330_v46  ;;  %v4018_v46 = vor.u32 %v4759_v37, %v4015_v38  ;;  %v4637_v38 = vld [vmem:[#allocation5 + $0x264] sm:$0xf0]  ;;  %v3421_v26 = vld [vmem:[#allocation5 + $0x190] sm:$0xf] }
  0xe9   : > { %2352 = vmatpush.bf16.msrb.mxu0 %v3730_v52  ;;  %v4801_v52 = vld [vmem:[#allocation5 + $0x78c] sm:$0xf]  ;;  %v4613_v27 = vld [vmem:[#allocation5 + $0x1a4] sm:$0xf0] }
  0xea   : > { %2366 = vmatpush.bf16.msrb.mxu1 %v3922_v53  ;;  %v4183_v53 = vld [vmem:[#allocation5 + $0x7a0] sm:$0xf0] }
  0xeb   : > { %2380 = vmatpush.bf16.msrb.mxu2 %v4114_v54  ;;  %v3397_v54 = vld [vmem:[#allocation5 + $0x160] sm:$0xf] }
  0xec   : > { %2394 = vmatpush.bf16.msrb.mxu3 %v4306_v59  ;;  %v4655_v59 = vld [vmem:[#allocation5 + $0x2f4] sm:$0xf0] }
  0xed   : > { %2353 = vmatpush.bf16.msrb.mxu0 %v3706_v1  ;;  %v4751_v1 = vld [vmem:[#allocation5 + $0x5f4] sm:$0xf0]  ;;  %v3590_v4 = vor.u32 %v4655_v59, %v3589_v56  ;;  %v3302_v56 = vor.u32 %v4583_v48, %v3301_v47 }
  0xee   : > { %2367 = vmatpush.bf16.msrb.mxu1 %v3898_v2  ;;  %v4186_v2 = vor.u32 %v4801_v52, %v4183_v53  ;;  %v3974_v10 = vor.u32 %v4751_v1, %v3973_v0  ;;  %v3685_v52 = vld [vmem:[#allocation5 + $0x3a0] sm:$0xf]  ;;  %v4679_v53 = vld [vmem:[#allocation5 + $0x3b4] sm:$0xf0]  ;;  %v4625_v0 = vld [vmem:[#allocation5 + $0x204] sm:$0xf0] }
  0xef   : > { %2381 = vmatpush.bf16.msrb.mxu2 %v4090_v3  ;;  %v3398_v3 = vor.u32 %v4607_v55, %v3397_v54  ;;  %v3877_v54 = vld [vmem:[#allocation5 + $0x520] sm:$0xf]  ;;  %v4727_v55 = vld [vmem:[#allocation5 + $0x534] sm:$0xf0]  ;;  %v3686_v59 = vor.u32 %v4679_v53, %v3685_v52  ;;  %v3661_v1 = vld [vmem:[#allocation5 + $0x370] sm:$0xf] }
  0xf0   : > { %2395 = vmatpush.bf16.msrb.mxu3 %v4282_v8  ;;  %v4601_v8 = vld [vmem:[#allocation5 + $0x144] sm:$0xf0]  ;;  %v4333_v53 = vld [vmem:[#allocation5 + $0x8b0] sm:$0xf] }
  0xf1   : > { %2354 = vmatpush.bf16.msrb.mxu0 %v3682_v14  ;;  %v3949_v14 = vld [vmem:[#allocation5 + $0x5b0] sm:$0xf]  ;;  %v4793_v52 = vld [vmem:[#allocation5 + $0x744] sm:$0xf0] }
  0xf2   : > { %2368 = vmatpush.bf16.msrb.mxu1 %v3874_v15  ;;  %v4745_v15 = vld [vmem:[#allocation5 + $0x5c4] sm:$0xf0] }
  0xf3   : > { %2382 = vmatpush.bf16.msrb.mxu2 %v4066_v16  ;;  %v3374_v16 = vor.u32 %v4601_v8, %v3373_v7  ;;  %v3950_v24 = vor.u32 %v4745_v15, %v3949_v14  ;;  %v3637_v14 = vld [vmem:[#allocation5 + $0x340] sm:$0xf]  ;;  %v4667_v15 = vld [vmem:[#allocation5 + $0x354] sm:$0xf0] }
  0xf4   : > { %2396 = vmatpush.bf16.msrb.mxu3 %v4258_v20  ;;  %v4595_v20 = vld [vmem:[#allocation5 + $0x114] sm:$0xf0]  ;;  %v3638_v25 = vor.u32 %v4667_v15, %v3637_v14  ;;  %v5463_v14 = vpop.f32.mrf.mxu3 }
  0xf5   : > { %2355 = vmatpush.bf16.msrb.mxu0 %v3658_v28  ;;  %v3925_v28 = vld [vmem:[#allocation5 + $0x580] sm:$0xf] }
  0xf6   : > { %2369 = vmatpush.bf16.msrb.mxu1 %v3850_v29  ;;  %v4739_v29 = vld [vmem:[#allocation5 + $0x594] sm:$0xf0] }
  0xf7   : > { %2383 = vmatpush.bf16.msrb.mxu2 %v4042_v30  ;;  %v3350_v30 = vor.u32 %v4595_v20, %v3349_v19  ;;  %v3926_v37 = vor.u32 %v4739_v29, %v3925_v28  ;;  %v3229_v19 = vld [vmem:[#allocation5 + $0x10] sm:$0xf]  ;;  %v4565_v20 = vld [vmem:[#allocation5 + $0x24] sm:$0xf0] }
  0xf8   : > { %2397 = vmatpush.bf16.msrb.mxu3 %v4234_v34  ;;  %v4589_v34 = vld [vmem:[#allocation5 + $0xe4] sm:$0xf0]  ;;  %v3613_v28 = vld [vmem:[#allocation5 + $0x310] sm:$0xf] }
  0xf9   : > { %2356 = vmatpush.bf16.msrb.mxu0 %v3634_v42  ;;  %v3901_v42 = vld [vmem:[#allocation5 + $0x550] sm:$0xf]  ;;  %v3326_v44 = vor.u32 %v4589_v34, %v3325_v33  ;;  %v5451_v33 = vpop.f32.mrf.mxu1  ;;  %v4165_v34 = vld [vmem:[#allocation5 + $0x760] sm:$0xf] }
  0xfa   : > { %2370 = vmatpush.bf16.msrb.mxu1 %v3826_v45  ;;  %v3518_v45 = vor.u32 %v4637_v38, %v3517_v36  ;;  %v4799_v36 = vld [vmem:[#allocation5 + $0x774] sm:$0xf0]  ;;  %v3230_v38 = vor.u32 %v4565_v20, %v3229_v19  ;;  %v4285_v19 = vld [vmem:[#allocation5 + $0x850] sm:$0xf] }
  0xfb   : > { %2384 = vmatpush.bf16.msrb.mxu2 %v4018_v46  ;;  %v3710_v46 = vor.u32 %v4685_v41, %v3709_v40  ;;  %v4847_v40 = vld [vmem:[#allocation5 + $0x8f4] sm:$0xf0]  ;;  %v4604_v41 = vld [vmem:[#allocation5 + $0x164] sm:$0xf]  ;;  %v4166_v48 = vor.u32 %v4799_v36, %v4165_v34  ;;  %v4261_v36 = vld [vmem:[#allocation5 + $0x820] sm:$0xf] }
  0xfc   : > { %2398 = vmatpush.bf16.msrb.mxu3 %v4210_v50  ;;  %v3902_v50 = vor.u32 %v4733_v43, %v3901_v42  ;;  %v3399_v42 = vld [vmem:[#allocation5 + $0x178] sm:$0xf0]  ;;  %v3422_v43 = vor.u32 %v4613_v27, %v3421_v26  ;;  %v3327_v26 = vld [vmem:[#allocation5 + $0xe8] sm:$0xf0]  ;;  %v4634_v27 = vld [vmem:[#allocation5 + $0x254] sm:$0xf] }
  0xfd   : > { %2357 = vmatpush.bf16.msrb.mxu0 %v3610_v58  ;;  %v3494_v58 = vor.u32 %v4631_v51, %v3493_v49  ;;  %v4141_v51 = vld [vmem:[#allocation5 + $0x730] sm:$0xf]  ;;  %v4775_v34 = vld [vmem:[#allocation5 + $0x6b4] sm:$0xf0] }
  0xfe   : > { %2371 = vmatpush.bf16.msrb.mxu1 %v3802_v62  ;;  %v3469_v62 = vld [vmem:[#allocation5 + $0x1f0] sm:$0xf] }
  0xff   : > { %2385 = vmatpush.bf16.msrb.mxu2 %v3994_v63  ;;  %v3878_v63 = vor.u32 %v4727_v55, %v3877_v54  ;;  %v3470_v7 = vor.u32 %v4625_v0, %v3469_v62  ;;  %v4841_v55 = vld [vmem:[#allocation5 + $0x8c4] sm:$0xf0]  ;;  %v5453_v62 = vpop.f32.mrf.mxu0 }
 0x100   : > { %2399 = vmatpush.bf16.msrb.mxu3 %v4186_v2  ;;  %2358 = vmatmul.bf16.vlgmr.msrb.gmra.mxu0 %v5415_v22  ;;  %v4673_v2 = vld [vmem:[#allocation5 + $0x384] sm:$0xf0]  ;;  %v4334_v0 = vor.u32 %v4841_v55, %v4333_v53  ;;  %v4574_v55 = vld [vmem:[#allocation5 + $0x74] sm:$0xf] }
 0x101   : > { %2406 = vmatpush.bf16.msra.mxu0 %v3398_v3  ;;  %2372 = vmatmul.bf16.vlgmr.msrb.gmra.mxu1 %v5417_v23  ;;  %v3853_v3 = vld [vmem:[#allocation5 + $0x4f0] sm:$0xf]  ;;  %v3662_v8 = vor.u32 %v4673_v2, %v3661_v1  ;;  %v4117_v2 = vld [vmem:[#allocation5 + $0x700] sm:$0xf] }
 0x102   : > { %2420 = vmatpush.bf16.msra.mxu1 %v3590_v4  ;;  %2386 = vmatmul.bf16.vlgmr.msrb.gmra.mxu2 %v5425_v35  ;;  %v4721_v4 = vld [vmem:[#allocation5 + $0x504] sm:$0xf0] }
 0x103   : > { %2434 = vmatpush.bf16.msra.mxu2 %v3782_v5  ;;  %2400 = vmatmul.bf16.vlgmr.msrb.gmra.mxu3 %v5427_v39  ;;  %v3278_v5 = vor.u32 %v4577_v61, %v3277_v60  ;;  %v3854_v12 = vor.u32 %v4721_v4, %v3853_v3  ;;  %v3567_v60 = vld [vmem:[#allocation5 + $0x2c8] sm:$0xf0]  ;;  %v4142_v61 = vor.u32 %v4793_v52, %v4141_v51  ;;  %v4787_v3 = vld [vmem:[#allocation5 + $0x714] sm:$0xf0]  ;;  %v4309_v4 = vld [vmem:[#allocation5 + $0x880] sm:$0xf] }
 0x104   : > { %2448 = vmatpush.bf16.msra.mxu3 %v3974_v10  ;;  %v4571_v10 = vld [vmem:[#allocation5 + $0x54] sm:$0xf0]  ;;  %v4769_v51 = vld [vmem:[#allocation5 + $0x684] sm:$0xf0]  ;;  %v4237_v52 = vld [vmem:[#allocation5 + $0x7f0] sm:$0xf] }
 0x105   : > { %2407 = vmatpush.bf16.msra.mxu0 %v3374_v16  ;;  %v3829_v16 = vld [vmem:[#allocation5 + $0x4c0] sm:$0xf] }
 0x106   : > { %2421 = vmatpush.bf16.msra.mxu1 %v3566_v17  ;;  %v4715_v17 = vld [vmem:[#allocation5 + $0x4d4] sm:$0xf0] }
 0x107   : > { %2435 = vmatpush.bf16.msra.mxu2 %v3758_v18  ;;  %v3254_v18 = vor.u32 %v4571_v10, %v3253_v9  ;;  %v3830_v29 = vor.u32 %v4715_v17, %v3829_v16  ;;  %v3351_v9 = vld [vmem:[#allocation5 + $0x118] sm:$0xf0]  ;;  %v5458_v10 = vpop.f32.mrf.mxu1  ;;  %v4093_v17 = vld [vmem:[#allocation5 + $0x6d0] sm:$0xf] }
 0x108   : > { %2449 = vmatpush.bf16.msra.mxu3 %v3950_v24  ;;  %v3446_v24 = vor.u32 %v4619_v13, %v3445_v11  ;;  %v4640_v11 = vld [vmem:[#allocation5 + $0x284] sm:$0xf]  ;;  %v4118_v13 = vor.u32 %v4787_v3, %v4117_v2  ;;  %v4021_v2 = vld [vmem:[#allocation5 + $0x640] sm:$0xf]  ;;  %v4763_v3 = vld [vmem:[#allocation5 + $0x654] sm:$0xf0] }
 0x109   : > { %2408 = vmatpush.bf16.msra.mxu0 %v3350_v30  ;;  %v4661_v30 = vld [vmem:[#allocation5 + $0x324] sm:$0xf0] }
 0x10a   : > { %2422 = vmatpush.bf16.msra.mxu1 %v3542_v31  ;;  %v3805_v31 = vld [vmem:[#allocation5 + $0x490] sm:$0xf] }
 0x10b   : > { %2436 = vmatpush.bf16.msra.mxu2 %v3734_v32  ;;  %v4709_v32 = vld [vmem:[#allocation5 + $0x4a4] sm:$0xf0] }
 0x10c   : > { %2450 = vmatpush.bf16.msra.mxu3 %v3926_v37  ;;  %v4357_v37 = vld [vmem:[#allocation5 + $0x8e0] sm:$0xf]  ;;  %v3806_v47 = vor.u32 %v4709_v32, %v3805_v31 }
 0x10d   : > { %2409 = vmatpush.bf16.msra.mxu0 %v3326_v44  ;;  %v3614_v44 = vor.u32 %v4661_v30, %v3613_v28  ;;  %v4358_v49 = vor.u32 %v4847_v40, %v4357_v37  ;;  %v3519_v28 = vld [vmem:[#allocation5 + $0x268] sm:$0xf0]  ;;  %v4069_v32 = vld [vmem:[#allocation5 + $0x6a0] sm:$0xf]  ;;  %v4580_v40 = vld [vmem:[#allocation5 + $0xa4] sm:$0xf] }
 0x10e   : > { %2423 = vmatpush.bf16.msra.mxu1 %v3518_v45  ;;  %v4652_v45 = vld [vmem:[#allocation5 + $0x2e4] sm:$0xf]  ;;  %v3522_v37 = vor.u32 %v4634_v27, %v3519_v28  ;;  %v3231_v28 = vld [vmem:[#allocation5 + $0x28] sm:$0xf0] }
 0x10f   : > { %2437 = vmatpush.bf16.msra.mxu2 %v3710_v46  ;;  %v3591_v46 = vld [vmem:[#allocation5 + $0x2f8] sm:$0xf0] }
 0x110   : > { %2451 = vmatpush.bf16.msra.mxu3 %v3902_v50  ;;  %v3402_v50 = vor.u32 %v4604_v41, %v3399_v42  ;;  %v3594_v54 = vor.u32 %v4652_v45, %v3591_v46  ;;  %v3303_v41 = vld [vmem:[#allocation5 + $0xb8] sm:$0xf0]  ;;  %v5465_v42 = vpop.f32.mrf.mxu0  ;;  %v4070_v46 = vor.u32 %v4775_v34, %v4069_v32  ;;  %v4700_v34 = vld [vmem:[#allocation5 + $0x464] sm:$0xf] }
 0x111   : > { %2410 = vmatpush.bf16.msra.mxu0 %v3302_v56  ;;  %v4598_v56 = vld [vmem:[#allocation5 + $0x134] sm:$0xf]  ;;  %v3495_v45 = vld [vmem:[#allocation5 + $0x238] sm:$0xf0] }
 0x112   : > { %2424 = vmatpush.bf16.msra.mxu1 %v3494_v58  ;;  %v3375_v58 = vld [vmem:[#allocation5 + $0x148] sm:$0xf0] }
 0x113   : > { %2438 = vmatpush.bf16.msra.mxu2 %v3686_v59  ;;  %v4646_v59 = vld [vmem:[#allocation5 + $0x2b4] sm:$0xf]  ;;  %v3378_v1 = vor.u32 %v4598_v56, %v3375_v58  ;;  %v3279_v56 = vld [vmem:[#allocation5 + $0x88] sm:$0xf0]  ;;  %v5471_v58 = vpop.f32.mrf.mxu3 }
 0x114   : > { %2452 = vmatpush.bf16.msra.mxu3 %v3878_v63  ;;  %v5455_v63 = vpop.f32.mrf.mxu2 }
 0x115   : > { %2411 = vmatpush.bf16.msra.mxu0 %v3278_v5  ;;  %v3570_v5 = vor.u32 %v4646_v59, %v3567_v60  ;;  %v4622_v59 = vld [vmem:[#allocation5 + $0x1f4] sm:$0xf]  ;;  %v3471_v60 = vld [vmem:[#allocation5 + $0x208] sm:$0xf0] }
 0x116   : > { %2425 = vmatpush.bf16.msra.mxu1 %v3470_v7  ;;  %v4835_v7 = vld [vmem:[#allocation5 + $0x894] sm:$0xf0] }
 0x117   : > { %2439 = vmatpush.bf16.msra.mxu2 %v3662_v8  ;;  %v4592_v8 = vld [vmem:[#allocation5 + $0x104] sm:$0xf]  ;;  %v4310_v15 = vor.u32 %v4835_v7, %v4309_v4  ;;  %v4213_v4 = vld [vmem:[#allocation5 + $0x7c0] sm:$0xf]  ;;  %v4811_v7 = vld [vmem:[#allocation5 + $0x7d4] sm:$0xf0] }
 0x118   : > { %2453 = vmatpush.bf16.msra.mxu3 %v3854_v12  ;;  %v3543_v12 = vld [vmem:[#allocation5 + $0x298] sm:$0xf0]  ;;  %v3354_v16 = vor.u32 %v4592_v8, %v3351_v9  ;;  %v4568_v8 = vld [vmem:[#allocation5 + $0x44] sm:$0xf] }
 0x119   : > { %2412 = vmatpush.bf16.msra.mxu0 %v3254_v18  ;;  %v4781_v18 = vld [vmem:[#allocation5 + $0x6e4] sm:$0xf0]  ;;  %v3546_v20 = vor.u32 %v4640_v11, %v3543_v12  ;;  %v3255_v9 = vld [vmem:[#allocation5 + $0x58] sm:$0xf0]  ;;  %v4616_v12 = vld [vmem:[#allocation5 + $0x1c4] sm:$0xf] }
 0x11a   : > { %2426 = vmatpush.bf16.msra.mxu1 %v3446_v24  ;;  %v4829_v24 = vld [vmem:[#allocation5 + $0x864] sm:$0xf0] }
 0x11b   : > { %2440 = vmatpush.bf16.msra.mxu2 %v3638_v25  ;;  %v4586_v25 = vld [vmem:[#allocation5 + $0xd4] sm:$0xf]  ;;  %v4286_v30 = vor.u32 %v4829_v24, %v4285_v19  ;;  %v4214_v19 = vor.u32 %v4811_v7, %v4213_v4  ;;  %v4189_v24 = vld [vmem:[#allocation5 + $0x790] sm:$0xf]  ;;  %v5479_v32 = vpop.f32.mrf.mxu3  ;;  %v4335_v4 = vld [vmem:[#allocation5 + $0x8c8] sm:$0xf0] }
 0x11c   : > { %2454 = vmatpush.bf16.msra.mxu3 %v3830_v29  ;;  %v4094_v29 = vor.u32 %v4781_v18, %v4093_v17  ;;  %v3330_v31 = vor.u32 %v4586_v25, %v3327_v26  ;;  %v4757_v17 = vld [vmem:[#allocation5 + $0x624] sm:$0xf0]  ;;  %v5475_v18 = vpop.f32.mrf.mxu0  ;;  %v4562_v26 = vld [vmem:[#allocation5 + $0x14] sm:$0xf] }
 0x11d   : > { %2413 = vmatpush.bf16.msra.mxu0 %v3230_v38  ;;  %v4823_v38 = vld [vmem:[#allocation5 + $0x834] sm:$0xf0]  ;;  %v4805_v25 = vld [vmem:[#allocation5 + $0x7a4] sm:$0xf0] }
 0x11e   : > { %2427 = vmatpush.bf16.msra.mxu1 %v3422_v43  ;;  %v5467_v43 = vpop.f32.mrf.mxu2 }
 0x11f   : > { %2441 = vmatpush.bf16.msra.mxu2 %v3614_v44  ;;  %v4628_v44 = vld [vmem:[#allocation5 + $0x224] sm:$0xf] }
 0x120   : > { %2455 = vmatpush.bf16.msra.mxu3 %v3806_v47  ;;  %2414 = vmatmul.bf16.vlgmr.msra.gmra.mxu0 %v5403_v57  ;;  %v5469_v47 = vpop.f32.mrf.mxu1  ;;  %v3498_v53 = vor.u32 %v4628_v44, %v3495_v45  ;;  %v4167_v44 = vld [vmem:[#allocation5 + $0x778] sm:$0xf0]  ;;  %v4190_v45 = vor.u32 %v4805_v25, %v4189_v24  ;;  %v4832_v25 = vld [vmem:[#allocation5 + $0x884] sm:$0xf] }
 0x121   : > { %2462 = vmatpush.bf16.msrb.mxu0 %v4166_v48  ;;  %2428 = vmatmul.bf16.vlgmr.msra.gmra.mxu1 %v5408_v6  ;;  %v4262_v48 = vor.u32 %v4823_v38, %v4261_v36  ;;  %v3783_v36 = vld [vmem:[#allocation5 + $0x478] sm:$0xf0] }
 0x122   : > { %2476 = vmatpush.bf16.msrb.mxu1 %v4358_v49  ;;  %2442 = vmatmul.bf16.vlgmr.msra.gmra.mxu2 %v5415_v22  ;;  %v3306_v49 = vor.u32 %v4580_v40, %v3303_v41  ;;  %v3975_v40 = vld [vmem:[#allocation5 + $0x5f8] sm:$0xf0]  ;;  %v4796_v41 = vld [vmem:[#allocation5 + $0x764] sm:$0xf] }
 0x123   : > { %2490 = vmatpush.bf16.msrb.mxu2 %v3402_v50  ;;  %2456 = vmatmul.bf16.vlgmr.msra.gmra.mxu3 %v5417_v23  ;;  %v4045_v50 = vld [vmem:[#allocation5 + $0x670] sm:$0xf]  ;;  %v5488_v24 = vpop.f32.mrf.mxu3 }
 0x124   : > { %2504 = vmatpush.bf16.msrb.mxu3 %v3594_v54  ;;  %v4817_v54 = vld [vmem:[#allocation5 + $0x804] sm:$0xf0] }
 0x125   : > { %2463 = vmatpush.bf16.msrb.mxu0 %v4142_v61  ;;  %v4046_v61 = vor.u32 %v4769_v51, %v4045_v50  ;;  %v3786_v51 = vor.u32 %v4700_v34, %v3783_v36  ;;  %v3711_v34 = vld [vmem:[#allocation5 + $0x3e8] sm:$0xf0]  ;;  %v4730_v36 = vld [vmem:[#allocation5 + $0x554] sm:$0xf] }
 0x126   : > { %2477 = vmatpush.bf16.msrb.mxu1 %v4334_v0  ;;  %v4238_v0 = vor.u32 %v4817_v54, %v4237_v52  ;;  %v5473_v11 = vpop.f32.mrf.mxu2  ;;  %v4694_v54 = vld [vmem:[#allocation5 + $0x434] sm:$0xf] }
 0x127   : > { %2491 = vmatpush.bf16.msrb.mxu2 %v3378_v1  ;;  %v3282_v1 = vor.u32 %v4574_v55, %v3279_v56  ;;  %v3759_v55 = vld [vmem:[#allocation5 + $0x448] sm:$0xf0]  ;;  %v4742_v56 = vld [vmem:[#allocation5 + $0x5b4] sm:$0xf] }
 0x128   : > { %2505 = vmatpush.bf16.msrb.mxu3 %v3570_v5  ;;  %v3474_v5 = vor.u32 %v4622_v59, %v3471_v60  ;;  %v3951_v60 = vld [vmem:[#allocation5 + $0x5c8] sm:$0xf0] }
 0x129   : > { %2464 = vmatpush.bf16.msrb.mxu0 %v4118_v13  ;;  %v3447_v13 = vld [vmem:[#allocation5 + $0x1d8] sm:$0xf0] }
 0x12a   : > { %2478 = vmatpush.bf16.msrb.mxu1 %v4310_v15  ;;  %v4022_v15 = vor.u32 %v4763_v3, %v4021_v2  ;;  %v3450_v27 = vor.u32 %v4616_v12, %v3447_v13  ;;  %v5483_v2 = vpop.f32.mrf.mxu0  ;;  %v4838_v3 = vld [vmem:[#allocation5 + $0x8b4] sm:$0xf]  ;;  %v4688_v12 = vld [vmem:[#allocation5 + $0x404] sm:$0xf]  ;;  %v3735_v13 = vld [vmem:[#allocation5 + $0x418] sm:$0xf0] }
 0x12b   : > { %2492 = vmatpush.bf16.msrb.mxu2 %v3354_v16  ;;  %v3997_v16 = vld [vmem:[#allocation5 + $0x610] sm:$0xf] }
 0x12c   : > { %2506 = vmatpush.bf16.msrb.mxu3 %v3546_v20  ;;  %v3258_v20 = vor.u32 %v4568_v8, %v3255_v9  ;;  %v3998_v38 = vor.u32 %v4757_v17, %v3997_v16  ;;  %v3954_v8 = vor.u32 %v4742_v56, %v3951_v60  ;;  %v4338_v16 = vor.u32 %v4838_v3, %v4335_v4  ;;  %v3927_v17 = vld [vmem:[#allocation5 + $0x598] sm:$0xf0]  ;;  %v4820_v60 = vld [vmem:[#allocation5 + $0x824] sm:$0xf]  ;;  %v5499_v3 = vpop.f32.mrf.mxu3 }
 0x12d   : > { %2465 = vmatpush.bf16.msrb.mxu0 %v4094_v29  ;;  %v4610_v29 = vld [vmem:[#allocation5 + $0x194] sm:$0xf]  ;;  %v4071_v56 = vld [vmem:[#allocation5 + $0x6b8] sm:$0xf0] }
 0x12e   : > { %2479 = vmatpush.bf16.msrb.mxu1 %v4286_v30  ;;  %v3423_v30 = vld [vmem:[#allocation5 + $0x1a8] sm:$0xf0] }
 0x12f   : > { %2493 = vmatpush.bf16.msrb.mxu2 %v3330_v31  ;;  %v5477_v31 = vpop.f32.mrf.mxu1  ;;  %v3426_v50 = vor.u32 %v4610_v29, %v3423_v30  ;;  %v4682_v30 = vld [vmem:[#allocation5 + $0x3d4] sm:$0xf] }
 0x130   : > { %2507 = vmatpush.bf16.msrb.mxu3 %v3522_v37  ;;  %v4748_v37 = vld [vmem:[#allocation5 + $0x5e4] sm:$0xf] }
 0x131   : > { %2466 = vmatpush.bf16.msrb.mxu0 %v4070_v46  ;;  %v3234_v46 = vor.u32 %v4562_v26, %v3231_v28  ;;  %v3978_v52 = vor.u32 %v4748_v37, %v3975_v40  ;;  %v4311_v26 = vld [vmem:[#allocation5 + $0x898] sm:$0xf0]  ;;  %v4778_v40 = vld [vmem:[#allocation5 + $0x6d4] sm:$0xf] }
 0x132   : > { %2480 = vmatpush.bf16.msrb.mxu1 %v4262_v48  ;;  %v4844_v48 = vld [vmem:[#allocation5 + $0x8e4] sm:$0xf]  ;;  %v4314_v37 = vor.u32 %v4832_v25, %v4311_v26 }
 0x133   : > { %2494 = vmatpush.bf16.msrb.mxu2 %v3306_v49  ;;  %v4359_v49 = vld [vmem:[#allocation5 + $0x8f8] sm:$0xf0] }
 0x134   : > { %2508 = vmatpush.bf16.msrb.mxu3 %v3498_v53  ;;  %v4170_v53 = vor.u32 %v4796_v41, %v4167_v44  ;;  %v4362_v59 = vor.u32 %v4844_v48, %v4359_v49  ;;  %v4095_v41 = vld [vmem:[#allocation5 + $0x6e8] sm:$0xf0]  ;;  %v4826_v44 = vld [vmem:[#allocation5 + $0x854] sm:$0xf]  ;;  %v5495_v48 = vpop.f32.mrf.mxu0 }
 0x135   : > { %2467 = vmatpush.bf16.msrb.mxu0 %v4046_v61  ;;  %v4790_v61 = vld [vmem:[#allocation5 + $0x734] sm:$0xf]  ;;  %v4098_v49 = vor.u32 %v4778_v40, %v4095_v41  ;;  %v4023_v40 = vld [vmem:[#allocation5 + $0x658] sm:$0xf0] }
 0x136   : > { %2481 = vmatpush.bf16.msrb.mxu1 %v4238_v0  ;;  %v4143_v0 = vld [vmem:[#allocation5 + $0x748] sm:$0xf0] }
 0x137   : > { %2495 = vmatpush.bf16.msrb.mxu2 %v3282_v1  ;;  %v5481_v1 = vpop.f32.mrf.mxu2  ;;  %v5485_v7 = vpop.f32.mrf.mxu1  ;;  %v4146_v9 = vor.u32 %v4790_v61, %v4143_v0  ;;  %v4263_v61 = vld [vmem:[#allocation5 + $0x838] sm:$0xf0] }
 0x138   : > { %2509 = vmatpush.bf16.msrb.mxu3 %v3474_v5  ;;  %v3762_v5 = vor.u32 %v4694_v54, %v3759_v55  ;;  %v3879_v54 = vld [vmem:[#allocation5 + $0x538] sm:$0xf0]  ;;  %v4772_v55 = vld [vmem:[#allocation5 + $0x6a4] sm:$0xf] }
 0x139   : > { %2468 = vmatpush.bf16.msrb.mxu0 %v4022_v15  ;;  %v4736_v15 = vld [vmem:[#allocation5 + $0x584] sm:$0xf] }
 0x13a   : > { %2482 = vmatpush.bf16.msrb.mxu1 %v4214_v19  ;;  %v4784_v19 = vld [vmem:[#allocation5 + $0x704] sm:$0xf]  ;;  %v3930_v28 = vor.u32 %v4736_v15, %v3927_v17  ;;  %v3855_v15 = vld [vmem:[#allocation5 + $0x508] sm:$0xf0] }
 0x13b   : > { %2496 = vmatpush.bf16.msrb.mxu2 %v3258_v20  ;;  %v4119_v20 = vld [vmem:[#allocation5 + $0x718] sm:$0xf0]  ;;  %v4047_v17 = vld [vmem:[#allocation5 + $0x688] sm:$0xf0] }
 0x13c   : > { %2510 = vmatpush.bf16.msrb.mxu3 %v3450_v27  ;;  %v3738_v27 = vor.u32 %v4688_v12, %v3735_v13  ;;  %v4122_v29 = vor.u32 %v4784_v19, %v4119_v20  ;;  %v4718_v12 = vld [vmem:[#allocation5 + $0x4f4] sm:$0xf]  ;;  %v4266_v13 = vor.u32 %v4820_v60, %v4263_v61  ;;  %v4239_v20 = vld [vmem:[#allocation5 + $0x808] sm:$0xf0]  ;;  %v5505_v61 = vpop.f32.mrf.mxu3 }
 0x13d   : > { %2469 = vmatpush.bf16.msrb.mxu0 %v3998_v38  ;;  %v3903_v38 = vld [vmem:[#allocation5 + $0x568] sm:$0xf0]  ;;  %v4814_v19 = vld [vmem:[#allocation5 + $0x7f4] sm:$0xf]  ;;  %v3858_v26 = vor.u32 %v4718_v12, %v3855_v15  ;;  %v4855_v15 = vld [vmem:[#allocation8 + $0x38] sm:$0xff] }
 0x13e   : > { %2483 = vmatpush.bf16.msrb.mxu1 %v4190_v45  ;;  %v3714_v45 = vor.u32 %v4682_v30, %v3711_v34  ;;  %v3639_v30 = vld [vmem:[#allocation5 + $0x358] sm:$0xf0]  ;;  %v4712_v34 = vld [vmem:[#allocation5 + $0x4c4] sm:$0xf]  ;;  %v3999_v60 = vld [vmem:[#allocation5 + $0x628] sm:$0xf0] }
 0x13f   : > { %2497 = vmatpush.bf16.msrb.mxu2 %v3234_v46  ;;  %v5493_v46 = vpop.f32.mrf.mxu2 }
 0x140   : > { %2511 = vmatpush.bf16.msrb.mxu3 %v3426_v50  ;;  %2470 = vmatmul.bf16.vlgmr.msrb.gmra.mxu0 %v5425_v35  ;;  %v4676_v50 = vld [vmem:[#allocation5 + $0x3a4] sm:$0xf] }
 0x141   : > { %2518 = vmatpush.bf16.msra.mxu0 %v3786_v51  ;;  %2484 = vmatmul.bf16.vlgmr.msrb.gmra.mxu1 %v5427_v39  ;;  %v3687_v51 = vld [vmem:[#allocation5 + $0x3b8] sm:$0xf0] }
 0x142   : > { %2532 = vmatpush.bf16.msra.mxu1 %v3978_v52  ;;  %2498 = vmatmul.bf16.vlgmr.msrb.gmra.mxu2 %v5403_v57  ;;  %v4287_v57 = vld [vmem:[#allocation5 + $0x868] sm:$0xf0]  ;;  %v4724_v52 = vld [vmem:[#allocation5 + $0x524] sm:$0xf]  ;;  %v3690_v0 = vor.u32 %v4676_v50, %v3687_v51  ;;  %v4658_v51 = vld [vmem:[#allocation5 + $0x314] sm:$0xf] }
 0x143   : > { %2546 = vmatpush.bf16.msra.mxu2 %v4170_v53  ;;  %2512 = vmatmul.bf16.vlgmr.msrb.gmra.mxu3 %v5408_v6  ;;  %v3906_v6 = vor.u32 %v4730_v36, %v3903_v38  ;;  %v4290_v53 = vor.u32 %v4826_v44, %v4287_v57  ;;  %v3882_v4 = vor.u32 %v4724_v52, %v3879_v54  ;;  %v4760_v38 = vld [vmem:[#allocation5 + $0x644] sm:$0xf]  ;;  %v4215_v57 = vld [vmem:[#allocation5 + $0x7d8] sm:$0xf0]  ;;  %v3615_v52 = vld [vmem:[#allocation5 + $0x328] sm:$0xf0] }
 0x144   : > { %2560 = vmatpush.bf16.msra.mxu3 %v4362_v59  ;;  %v5497_v59 = vpop.f32.mrf.mxu1  ;;  %v4242_v36 = vor.u32 %v4814_v19, %v4239_v20  ;;  %v4808_v44 = vld [vmem:[#allocation5 + $0x7c4] sm:$0xf]  ;;  %v4026_v50 = vor.u32 %v4760_v38, %v4023_v40  ;;  %v4862_v38 = vld [vmem:[#allocation8 + $0x70] sm:$0xff] }
 0x145   : > { %2519 = vmatpush.bf16.msra.mxu0 %v3762_v5  ;;  %v4074_v5 = vor.u32 %v4772_v55, %v4071_v56  ;;  %v4218_v54 = vor.u32 %v4808_v44, %v4215_v57  ;;  %v3807_v55 = vld [vmem:[#allocation5 + $0x4a8] sm:$0xf0]  ;;  %v4754_v56 = vld [vmem:[#allocation5 + $0x614] sm:$0xf]  ;;  %v4871_v19 = vld [vmem:[#allocation8 + $0xb8] sm:$0xff] }
 0x146   : > { %2533 = vmatpush.bf16.msra.mxu1 %v3954_v8  ;;  %v4670_v8 = vld [vmem:[#allocation5 + $0x374] sm:$0xf]  ;;  %v4002_v12 = vor.u32 %v4754_v56, %v3999_v60  ;;  %v2289_v44 = vpop.f32.mrf.mxu3  ;;  %v4860_v56 = vld [vmem:[#allocation8 + $0x60] sm:$0xff] }
 0x147   : > { %2547 = vmatpush.bf16.msra.mxu2 %v4146_v9  ;;  %v3663_v9 = vld [vmem:[#allocation5 + $0x388] sm:$0xf0]  ;;  %v5501_v41 = vpop.f32.mrf.mxu2  ;;  %v4870_v40 = vld [vmem:[#allocation8 + $0xb0] sm:$0xff] }
 0x148   : > { %2561 = vmatpush.bf16.msra.mxu3 %v4338_v16  ;;  %v4766_v16 = vld [vmem:[#allocation5 + $0x674] sm:$0xf]  ;;  %v3666_v25 = vor.u32 %v4670_v8, %v3663_v9  ;;  %v3618_v8 = vor.u32 %v4658_v51, %v3615_v52  ;;  %v4868_v60 = vld [vmem:[#allocation8 + $0xa0] sm:$0xff] }
 0x149   : > { %2520 = vmatpush.bf16.msra.mxu0 %v3738_v27  ;;  %v4050_v27 = vor.u32 %v4766_v16, %v4047_v17  ;;  %v4863_v17 = vld [vmem:[#allocation8 + $0x78] sm:$0xff] }
 0x14a   : > { %2534 = vmatpush.bf16.msra.mxu1 %v3930_v28  ;;  %v2247_v28 = vpop.f32.mrf.mxu0 }
 0x14b   : > { %2548 = vmatpush.bf16.msra.mxu2 %v4122_v29  ;;  %v4664_v29 = vld [vmem:[#allocation5 + $0x344] sm:$0xf] }
 0x14c   : > { %2562 = vmatpush.bf16.msra.mxu3 %v4314_v37  ;;  %v3831_v37 = vld [vmem:[#allocation5 + $0x4d8] sm:$0xf0] }
 0x14d   : > { %2521 = vmatpush.bf16.msra.mxu0 %v3714_v45  ;;  %v5503_v45 = vpop.f32.mrf.mxu1 }
 0x14e   : > { %2535 = vmatpush.bf16.msra.mxu1 %v3906_v6  ;;  %v3642_v6 = vor.u32 %v4664_v29, %v3639_v30  ;;  %v4854_v30 = vld [vmem:[#allocation8 + $0x30] sm:$0xff] }
 0x14f   : > { %2549 = vmatpush.bf16.msra.mxu2 %v4098_v49  ;;  %v3834_v49 = vor.u32 %v4712_v34, %v3831_v37  ;;  %v4879_v34 = vld [vmem:[#allocation8 + $0xf8] sm:$0xff] }
 0x150   : > { %2563 = vmatpush.bf16.msra.mxu3 %v4290_v53  ;;  %v4706_v53 = vld [vmem:[#allocation5 + $0x494] sm:$0xf] }
 0x151   : > { %2522 = vmatpush.bf16.msra.mxu0 %v3690_v0  ;;  %v4802_v0 = vld [vmem:[#allocation5 + $0x794] sm:$0xf]  ;;  %v3810_v9 = vor.u32 %v4706_v53, %v3807_v55 }
 0x152   : > { %2536 = vmatpush.bf16.msra.mxu1 %v3882_v4  ;;  %v4191_v4 = vld [vmem:[#allocation5 + $0x7a8] sm:$0xf0]  ;;  %v2249_v20 = vpop.f32.mrf.mxu0 }
 0x153   : > { %2550 = vmatpush.bf16.msra.mxu2 %v4074_v5  ;;  %v5507_v5 = vld [vmem:[#allocation7] sm:$0x3f]  ;;  %v4877_v55 = vld [vmem:[#allocation8 + $0xe8] sm:$0xff] }
 0x154   : > { %2564 = vmatpush.bf16.msra.mxu3 %v4266_v13  ;;  %v4194_v13 = vor.u32 %v4802_v0, %v4191_v4  ;;  %v618_v16 = vperm.slane %v5507_v5, 0  ;;  %v619_v29 = vperm.slane %v5507_v5, 1 }
 0x155   : > { %2523 = vmatpush.bf16.msra.mxu0 %v3666_v25  ;;  %v2275_v25 = vpop.f32.mrf.mxu2 }
 0x156   : > { %2537 = vmatpush.bf16.msra.mxu1 %v3858_v26  ;;  %v620_v26 = vperm.slane %v5507_v5, 2  ;;  %v2082_v37 = vadd.f32 %v5453_v62, %v618_v16  ;;  %v4853_v62 = vld [vmem:[#allocation8 + $0x28] sm:$0xff] }
 0x157   : > { %2551 = vmatpush.bf16.msra.mxu2 %v4050_v27  ;;  %v2263_v27 = vpop.f32.mrf.mxu1 }
 0x158   : > { %2565 = vmatpush.bf16.msra.mxu3 %v4242_v36  ;;  %v2080_v36 = vadd.f32 %v5449_v21, %v618_v16  ;;  %v2248_v57 = vadd.f32 %v2247_v28, %v620_v26  ;;  %v2166_v21 = vadd.f32 %v5481_v1, %v619_v29  ;;  %v2096_v28 = vadd.f32 %v5458_v10, %v2082_v37  ;;  %v4874_v37 = vld [vmem:[#allocation8 + $0xd0] sm:$0xff] }
 0x159   : > { %2524 = vmatpush.bf16.msra.mxu0 %v3642_v6  ;;  %v2250_v6 = vadd.f32 %v2249_v20, %v620_v26 }
 0x15a   : > { %2538 = vmatpush.bf16.msra.mxu1 %v3834_v49  ;;  %v2164_v49 = vadd.f32 %v5473_v11, %v619_v29  ;;  %v2094_v51 = vadd.f32 %v5451_v33, %v2080_v36  ;;  %v2180_v1 = vadd.f32 %v5488_v24, %v2166_v21  ;;  %v2110_v10 = vadd.f32 %v5467_v43, %v2096_v28  ;;  %v4873_v21 = vld [vmem:[#allocation8 + $0xc8] sm:$0xff] }
 0x15b   : > { %2552 = vmatpush.bf16.msra.mxu2 %v4026_v50  ;;  %v4878_v50 = vld [vmem:[#allocation8 + $0xf0] sm:$0xff]  ;;  %v2264_v52 = vadd.f32 %v2263_v27, %v2250_v6 }
 0x15c   : > { %2566 = vmatpush.bf16.msra.mxu3 %v4218_v54  ;;  %v2178_v11 = vadd.f32 %v5479_v32, %v2164_v49  ;;  %v4852_v54 = vld [vmem:[#allocation8 + $0x20] sm:$0xff]  ;;  %v2108_v33 = vadd.f32 %v5455_v63, %v2094_v51  ;;  %v2194_v24 = vadd.f32 %v5495_v48, %v2180_v1  ;;  %v2124_v43 = vadd.f32 %v5471_v58, %v2110_v10  ;;  %v4850_v48 = vld [vmem:[#allocation8 + $0x10] sm:$0xff] }
 0x15d   : > { %2525 = vmatpush.bf16.msra.mxu0 %v3618_v8  ;;  %v2277_v53 = vpop.f32.mrf.mxu2  ;;  %v2291_v8 = vpop.f32.mrf.mxu3  ;;  %v4858_v58 = vld [vmem:[#allocation8 + $0x50] sm:$0xff] }
 0x15e   : > { %2539 = vmatpush.bf16.msra.mxu1 %v3810_v9  ;;  %v2278_v4 = vadd.f32 %v2277_v53, %v2264_v52  ;;  %v2192_v32 = vadd.f32 %v5483_v2, %v2178_v11  ;;  %v4851_v9 = vld [vmem:[#allocation8 + $0x18] sm:$0xff]  ;;  %v2122_v63 = vadd.f32 %v5463_v14, %v2108_v33  ;;  %v2208_v2 = vadd.f32 %v5497_v59, %v2194_v24  ;;  %v4866_v27 = vld [vmem:[#allocation8 + $0x90] sm:$0xff]  ;;  %v4849_v59 = vld [vmem:[#allocation8 + $0x8] sm:$0xff] }
 0x15f   : > { %2553 = vmatpush.bf16.msra.mxu2 %v4002_v12  ;;  %v4876_v12 = vld [vmem:[#allocation8 + $0xe0] sm:$0xff]  ;;  %v2138_v14 = vadd.f32 %v5475_v18, %v2124_v43  ;;  %v4857_v18 = vld [vmem:[#allocation8 + $0x48] sm:$0xff] }
 0x160   : > { %2567 = vmatpush.bf16.msra.mxu3 %v4194_v13  ;;  %2526 = vmatmul.bf16.vlgmr.msra.gmra.mxu0 %v5415_v22  ;;  %v4861_v22 = vld [vmem:[#allocation8 + $0x68] sm:$0xff]  ;;  %v4859_v13 = vld [vmem:[#allocation8 + $0x58] sm:$0xff]  ;;  %v2206_v20 = vadd.f32 %v5485_v7, %v2192_v32  ;;  %v2136_v26 = vadd.f32 %v5465_v42, %v2122_v63  ;;  %v2222_v29 = vadd.f32 %v5501_v41, %v2208_v2  ;;  %v4872_v52 = vld [vmem:[#allocation8 + $0xc0] sm:$0xff] }
 0x161   : > { %2980 = vmatpush.bf16.msrb.mxu0 %v4855_v15  ;;  %2540 = vmatmul.bf16.vlgmr.msra.gmra.mxu1 %v5417_v23  ;;  %v4869_v23 = vld [vmem:[#allocation8 + $0xa8] sm:$0xff]  ;;  %v4867_v15 = vld [vmem:[#allocation8 + $0x98] sm:$0xff]  ;;  %v2152_v42 = vadd.f32 %v5477_v31, %v2138_v14  ;;  %v4864_v31 = vld [vmem:[#allocation8 + $0x80] sm:$0xff] }
 0x162   : > { %2994 = vmatpush.bf16.msrb.mxu1 %v4863_v17  ;;  %2554 = vmatmul.bf16.vlgmr.msra.gmra.mxu2 %v5425_v35  ;;  %v2262_v35 = vadd.f32 %v5503_v45, %v2248_v57  ;;  %v2317_v45 = vpop.f32.mrf.mxu1  ;;  %v2292_v17 = vadd.f32 %v2291_v8, %v2278_v4  ;;  %v2220_v7 = vadd.f32 %v5493_v46, %v2206_v20  ;;  %v4848_v46 = vld [vmem:[#allocation8] sm:$0xff] }
 0x163   : > { %3008 = vmatpush.bf16.msrb.mxu2 %v4871_v19  ;;  %2568 = vmatmul.bf16.vlgmr.msra.gmra.mxu3 %v5427_v39  ;;  %v2303_v39 = vpop.f32.mrf.mxu0 }
 0x164   : > { %3022 = vmatpush.bf16.msrb.mxu3 %v4879_v34  ;;  %v2276_v0 = vadd.f32 %v2275_v25, %v2262_v35  ;;  %v4875_v25 = vld [vmem:[#allocation8 + $0xd8] sm:$0xff]  ;;  %v2234_v6 = vadd.f32 %v5499_v3, %v2220_v7  ;;  %v621_v3 = vperm.slane %v5507_v5, 3  ;;  %v622_v7 = vperm.slane %v5507_v5, 4 }
 0x165   : > { %2981 = vmatpush.bf16.msrb.mxu0 %v4854_v30  ;;  %v2331_v49 = vpop.f32.mrf.mxu2 }
 0x166   : > { %2995 = vmatpush.bf16.msrb.mxu1 %v4862_v38  ;;  %v2290_v16 = vadd.f32 %v2289_v44, %v2276_v0  ;;  %v2150_v38 = vadd.f32 %v5469_v47, %v2136_v26  ;;  %v2236_v44 = vadd.f32 %v5505_v61, %v2222_v29  ;;  %v4856_v47 = vld [vmem:[#allocation8 + $0x40] sm:$0xff]  ;;  %v2345_v51 = vpop.f32.mrf.mxu3  ;;  %v2575_v61 = vmax.f32 %v2234_v6, 0.0  ;;  %v4881_v29 = vld [vmem:[#allocation8 + $0x108] sm:$0xff] }
 0x167   : > { %3009 = vmatpush.bf16.msrb.mxu2 %v4870_v40  ;;  %v4865_v40 = vld [vmem:[#allocation8 + $0x88] sm:$0xff]  ;;  %v2332_v11 = vadd.f32 %v2331_v49, %v621_v3 }
 0x168   : > { %3023 = vmatpush.bf16.msrb.mxu3 %v4878_v50  ;;  %v2304_v30 = vadd.f32 %v2303_v39, %v2290_v16  ;;  %v2580_v50 = vmax.f32 %v2152_v42, 0.0  ;;  %v2581_v28 = vmax.f32 %v2236_v44, 0.0  ;;  %v4894_v42 = vld [vmem:[#allocation8 + $0x170] sm:$0xff]  ;;  %v4893_v49 = vld [vmem:[#allocation8 + $0x168] sm:$0xff] }
 0x169   : > { %2982 = vmatpush.bf16.msrb.mxu0 %v4853_v62  ;;  %v2574_v62 = vmax.f32 %v2150_v38, 0.0 }
 0x16a   : > { %2996 = vmatpush.bf16.msrb.mxu1 %v4861_v22  ;;  %v2319_v36 = vpop.f32.mrf.mxu1  ;;  %v2318_v41 = vadd.f32 %v2317_v45, %v2304_v30  ;;  %v2587_v39 = vpack.c.bf16 %v2581_v28, %v2575_v61  ;;  %v4886_v45 = vld [vmem:[#allocation8 + $0x130] sm:$0xff]  ;;  %v4891_v61 = vld [vmem:[#allocation8 + $0x158] sm:$0xff] }
 0x16b   : > { %3010 = vmatpush.bf16.msrb.mxu2 %v4869_v23  ;;  %v2305_v19 = vpop.f32.mrf.mxu0  ;;  %v2586_v35 = vpack.c.bf16 %v2580_v50, %v2574_v62 }
 0x16c   : > { %3024 = vmatpush.bf16.msrb.mxu3 %v4877_v55  ;;  %v2306_v34 = vadd.f32 %v2305_v19, %v2292_v17  ;;  %v2576_v22 = vmax.f32 %v2318_v41, 0.0  ;;  %v2346_v55 = vadd.f32 %v2345_v51, %v2332_v11  ;;  %v4892_v51 = vld [vmem:[#allocation8 + $0x160] sm:$0xff] }
 0x16d   : > { %2983 = vmatpush.bf16.msrb.mxu0 %v4852_v54  ;;  %v2333_v1 = vpop.f32.mrf.mxu2 }
 0x16e   : > { %2997 = vmatpush.bf16.msrb.mxu1 %v4860_v56  ;;  %v2320_v57 = vadd.f32 %v2319_v36, %v2306_v34  ;;  %v2347_v54 = vpop.f32.mrf.mxu3  ;;  %v4887_v56 = vld [vmem:[#allocation8 + $0x138] sm:$0xff]  ;;  %v4880_v36 = vld [vmem:[#allocation8 + $0x100] sm:$0xff] }
 0x16f   : > { %3011 = vmatpush.bf16.msrb.mxu2 %v4868_v60  ;;  %v2334_v60 = vadd.f32 %v2333_v1, %v621_v3 }
 0x170   : > { %3025 = vmatpush.bf16.msrb.mxu3 %v4876_v12  ;;  %v2582_v23 = vmax.f32 %v2320_v57, 0.0  ;;  %v4885_v12 = vld [vmem:[#allocation8 + $0x128] sm:$0xff] }
 0x171   : > { %2984 = vmatpush.bf16.msrb.mxu0 %v4851_v9  ;;  %v2348_v4 = vadd.f32 %v2347_v54, %v2334_v60 }
 0x172   : > { %2998 = vmatpush.bf16.msrb.mxu1 %v4859_v13  ;;  %v2588_v53 = vpack.c.bf16 %v2582_v23, %v2576_v22  ;;  %v4884_v13 = vld [vmem:[#allocation8 + $0x120] sm:$0xff] }
 0x173   : > { %3012 = vmatpush.bf16.msrb.mxu2 %v4867_v15 }
 0x174   : > { %3026 = vmatpush.bf16.msrb.mxu3 %v4875_v25 }
 0x175   : > { %2985 = vmatpush.bf16.msrb.mxu0 %v4850_v48 }
 0x176   : > { %2999 = vmatpush.bf16.msrb.mxu1 %v4858_v58  ;;  %v4883_v58 = vld [vmem:[#allocation8 + $0x118] sm:$0xff] }
 0x177   : > { %3013 = vmatpush.bf16.msrb.mxu2 %v4866_v27  ;;  %v4882_v27 = vld [vmem:[#allocation8 + $0x110] sm:$0xff] }
 0x178   : > { %3027 = vmatpush.bf16.msrb.mxu3 %v4874_v37 }
 0x179   : > { %2986 = vmatpush.bf16.msrb.mxu0 %v4849_v59  ;;  %v4895_v59 = vld [vmem:[#allocation8 + $0x178] sm:$0xff] }
 0x17a   : > { %3000 = vmatpush.bf16.msrb.mxu1 %v4857_v18 }
 0x17b   : > { %3014 = vmatpush.bf16.msrb.mxu2 %v4865_v40 }
 0x17c   : > { %3028 = vmatpush.bf16.msrb.mxu3 %v4873_v21 }
 0x17d   : > { %2987 = vmatpush.bf16.msrb.mxu0 %v4848_v46  ;;  %v2359_v33 = vpop.f32.mrf.mxu0 }
 0x17e   : > { %3001 = vmatpush.bf16.msrb.mxu1 %v4856_v47  ;;  %v2373_v10 = vpop.f32.mrf.mxu1  ;;  %v2360_v0 = vadd.f32 %v2359_v33, %v2346_v55  ;;  %v4889_v55 = vld [vmem:[#allocation8 + $0x148] sm:$0xff] }
 0x17f   : > { %3015 = vmatpush.bf16.msrb.mxu2 %v4864_v31 }
 0x180   : > { %2988 = vmatmul.bf16.vlgmr.msrb.gmra.mxu0 %v2586_v35  ;;  %3029 = vmatpush.bf16.msrb.mxu3 %v4872_v52  ;;  %v2374_v32 = vadd.f32 %v2373_v10, %v2360_v0  ;;  %v4888_v10 = vld [vmem:[#allocation8 + $0x140] sm:$0xff] }
 0x181   : > { %3002 = vmatmul.bf16.vlgmr.msrb.gmra.mxu1 %v2587_v39  ;;  %3036 = vmatpush.bf16.msra.mxu0 %v4887_v56 }
 0x182   : > { %3016 = vmatmul.bf16.vlgmr.msrb.gmra.mxu2 %v2588_v53  ;;  %3050 = vmatpush.bf16.msra.mxu1 %v4895_v59  ;;  %v4890_v53 = vld [vmem:[#allocation8 + $0x150] sm:$0xff] }
 0x185   : > { %v2387_v8 = vpop.f32.mrf.mxu2  ;;  %3037 = vmatpush.bf16.msra.mxu0 %v4886_v45  ;;  %v2361_v24 = vpop.f32.mrf.mxu0  ;;  %v623_v45 = vperm.slane %v5507_v5, 5 }
 0x186   : > { %v2401_v9 = vpop.f32.mrf.mxu3  ;;  %v2362_v63 = vadd.f32 %v2361_v24, %v2348_v4  ;;  %v2375_v43 = vpop.f32.mrf.mxu1  ;;  %v2388_v15 = vadd.f32 %v2387_v8, %v2374_v32  ;;  %3051 = vmatpush.bf16.msra.mxu1 %v4894_v42  ;;  %v5000_v42 = vld [vmem:[#allocation10] ss:$0 sm:$0xff] }
 0x188   : > { %v2376_v16 = vadd.f32 %v2375_v43, %v2362_v63  ;;  %v2402_v19 = vadd.f32 %v2401_v9, %v2388_v15 }
 0x189   : > { %3038 = vmatpush.bf16.msra.mxu0 %v4885_v12 }
 0x18a   : > { %v2577_v25 = vmax.f32 %v2402_v19, 0.0  ;;  %3052 = vmatpush.bf16.msra.mxu1 %v4893_v49 }
 0x18d   : > { %v2389_v17 = vpop.f32.mrf.mxu2  ;;  %3039 = vmatpush.bf16.msra.mxu0 %v4884_v13 }
 0x18e   : > { %v2390_v20 = vadd.f32 %v2389_v17, %v2376_v16  ;;  %v2403_v2 = vpop.f32.mrf.mxu3  ;;  %3053 = vmatpush.bf16.msra.mxu1 %v4892_v51 }
 0x190   : > { %v2404_v48 = vadd.f32 %v2403_v2, %v2390_v20 }
 0x191   : > { %3040 = vmatpush.bf16.msra.mxu0 %v4883_v58 }
 0x192   : > { %v2583_v26 = vmax.f32 %v2404_v48, 0.0  ;;  %3054 = vmatpush.bf16.msra.mxu1 %v4891_v61 }
 0x194   : > { %v2589_v14 = vpack.c.bf16 %v2583_v26, %v2577_v25 }
 0x195   : > { %3041 = vmatpush.bf16.msra.mxu0 %v4882_v27 }
 0x196   : > { %3030 = vmatmul.bf16.vlgmr.msrb.gmra.mxu3 %v2589_v14  ;;  %3055 = vmatpush.bf16.msra.mxu1 %v4890_v53 }
 0x199   : > { %3042 = vmatpush.bf16.msra.mxu0 %v4881_v29 }
 0x19a   : > { %3056 = vmatpush.bf16.msra.mxu1 %v4889_v55 }
 0x19d   : > { %v2415_v30 = vpop.f32.mrf.mxu0  ;;  %3043 = vmatpush.bf16.msra.mxu0 %v4880_v36 }
 0x19e   : > { %v2429_v34 = vpop.f32.mrf.mxu1  ;;  %v2416_v37 = vadd.f32 %v2415_v30, %v622_v7  ;;  %3057 = vmatpush.bf16.msra.mxu1 %v4888_v10 }
 0x1a0   : > { %v2430_v40 = vadd.f32 %v2429_v34, %v2416_v37 }
 0x1a5   : > { %v2443_v38 = vpop.f32.mrf.mxu2  ;;  %v2417_v18 = vpop.f32.mrf.mxu0 }
 0x1a6   : > { %v2431_v44 = vpop.f32.mrf.mxu1  ;;  %v2457_v41 = vpop.f32.mrf.mxu3  ;;  %v2418_v57 = vadd.f32 %v2417_v18, %v622_v7  ;;  %v2444_v6 = vadd.f32 %v2443_v38, %v2430_v40 }
 0x1a8   : > { %v2432_v46 = vadd.f32 %v2431_v44, %v2418_v57  ;;  %v2458_v62 = vadd.f32 %v2457_v41, %v2444_v6 }
 0x1ad   : > { %v2445_v21 = vpop.f32.mrf.mxu2 }
 0x1ae   : > { %v2446_v31 = vadd.f32 %v2445_v21, %v2432_v46  ;;  %v2459_v28 = vpop.f32.mrf.mxu3 }
 0x1b0   : > { %v2460_v23 = vadd.f32 %v2459_v28, %v2446_v31 }
 0x1bd   : > { %v2471_v50 = vpop.f32.mrf.mxu0 }
 0x1be   : > { %v2485_v47 = vpop.f32.mrf.mxu1  ;;  %v2472_v22 = vadd.f32 %v2471_v50, %v2458_v62 }
 0x1c0   : > { %v2486_v35 = vadd.f32 %v2485_v47, %v2472_v22 }
 0x1c2   : > { %v2578_v11 = vmax.f32 %v2486_v35, 0.0 }
 0x1c5   : > { %v2473_v3 = vpop.f32.mrf.mxu0  ;;  %v2499_v56 = vpop.f32.mrf.mxu2 }
 0x1c6   : > { %v2474_v52 = vadd.f32 %v2473_v3, %v2460_v23  ;;  %v2487_v39 = vpop.f32.mrf.mxu1  ;;  %v2513_v60 = vpop.f32.mrf.mxu3  ;;  %v2500_v8 = vadd.f32 %v2499_v56, %v623_v45 }
 0x1c8   : > { %v2488_v1 = vadd.f32 %v2487_v39, %v2474_v52  ;;  %v2514_v9 = vadd.f32 %v2513_v60, %v2500_v8 }
 0x1ca   : > { %v2584_v54 = vmax.f32 %v2488_v1, 0.0 }
 0x1cc   : > { %v2590_v33 = vpack.c.bf16 %v2584_v54, %v2578_v11 }
 0x1cd   : > { %v2501_v0 = vpop.f32.mrf.mxu2 }
 0x1ce   : > { %3044 = vmatmul.bf16.vlgmr.msra.gmra.mxu0 %v2590_v33  ;;  %v2515_v4 = vpop.f32.mrf.mxu3  ;;  %v2502_v12 = vadd.f32 %v2501_v0, %v623_v45 }
 0x1d0   : > { %v2516_v15 = vadd.f32 %v2515_v4, %v2502_v12 }
 0x1dd   : > { %v2527_v32 = vpop.f32.mrf.mxu0 }
 0x1de   : > { %v2541_v24 = vpop.f32.mrf.mxu1  ;;  %v2528_v63 = vadd.f32 %v2527_v32, %v2514_v9 }
 0x1e0   : > { %v2542_v17 = vadd.f32 %v2541_v24, %v2528_v63 }
 0x1e5   : > { %v2555_v43 = vpop.f32.mrf.mxu2  ;;  %v2529_v16 = vpop.f32.mrf.mxu0 }
 0x1e6   : > { %v2569_v13 = vpop.f32.mrf.mxu3  ;;  %v2530_v19 = vadd.f32 %v2529_v16, %v2516_v15  ;;  %v2556_v20 = vadd.f32 %v2555_v43, %v2542_v17  ;;  %v2543_v2 = vpop.f32.mrf.mxu1 }
 0x1e8   : > { %v2544_v48 = vadd.f32 %v2543_v2, %v2530_v19  ;;  %v2570_v26 = vadd.f32 %v2569_v13, %v2556_v20 }
 0x1ea   : > { %v2579_v27 = vmax.f32 %v2570_v26, 0.0 }
 0x1ed   : > { %v2557_v25 = vpop.f32.mrf.mxu2 }
 0x1ee   : > { %v2558_v5 = vadd.f32 %v2557_v25, %v2544_v48  ;;  %v2571_v14 = vpop.f32.mrf.mxu3 }
 0x1f0   : > { %v2572_v58 = vadd.f32 %v2571_v14, %v2558_v5 }
 0x1f2   : > { %v2585_v29 = vmax.f32 %v2572_v58, 0.0 }
 0x1f4   : > { %v2591_v30 = vpack.c.bf16 %v2585_v29, %v2579_v27 }
 0x1f6   : > { %3058 = vmatmul.bf16.vlgmr.msra.gmra.mxu1 %v2591_v30 }
 0x1fd   : > { %v2989_v34 = vpop.f32.mrf.mxu0 }
 0x1fe   : > { %v3003_v36 = vpop.f32.mrf.mxu1  ;;  %v2990_v40 = vadd.f32 %v5000_v42, %v2989_v34 }
 0x200   : > { %v3004_v6 = vadd.f32 %v3003_v36, %v2990_v40 }
 0x205   : > { %v2991_v7 = vpop.f32.mrf.mxu0  ;;  %v3017_v59 = vpop.f32.mrf.mxu2 }
 0x206   : > { %v3005_v37 = vpop.f32.mrf.mxu1  ;;  %v2992_v44 = vadd.f32 %v5000_v42, %v2991_v7  ;;  %v3018_v21 = vadd.f32 %v3017_v59, %v3004_v6 }
 0x208   : > { %v3006_v46 = vadd.f32 %v3005_v37, %v2992_v44 }
 0x20d   : > { %v3019_v41 = vpop.f32.mrf.mxu2 }
 0x20e   : > { %v3020_v62 = vadd.f32 %v3019_v41, %v3006_v46 }
 0x219   : > { %v3031_v38 = vpop.f32.mrf.mxu3 }
 0x21a   : > { %v3032_v47 = vadd.f32 %v3031_v38, %v3018_v21 }
 0x221   : > { %v3033_v49 = vpop.f32.mrf.mxu3 }
 0x222   : > { %v3034_v31 = vadd.f32 %v3033_v49, %v3020_v62 }
 0x24b   : > { %v3045_v18 = vpop.f32.mrf.mxu0 }
 0x24c   : > { %v3046_v51 = vadd.f32 %v3045_v18, %v3032_v47 }
 0x253   : > { %v3047_v50 = vpop.f32.mrf.mxu0 }
 0x254   : > { %v3048_v28 = vadd.f32 %v3047_v50, %v3034_v31 }
 0x273   : > { %v3059_v57 = vpop.f32.mrf.mxu1 }
 0x274   : > { %v3060_v23 = vadd.f32 %v3059_v57, %v3046_v51 }
 0x27b   : > { %v3061_v22 = vpop.f32.mrf.mxu1 }
 0x27c   : > { %v3062_v61 = vadd.f32 %v3061_v22, %v3048_v28 }
 0x27e   : > { %v4900_v35 = vpack.c.bf16 %v3062_v61, %v3060_v23 }
 0x280   : > { %4901 = vst [vmem:[%s307_s9] sm:$0xff] %v4900_v35  }
 0x281   : > { %5178 = shalt.err (!%p5175_p10)
}
 0x282   : > { %s5237_s1 = smov 64   ;;  %s5238_s10 = smov 4  }
 0x283   : > { %4923 = dma.vmem_to_hbm [thread:$0]  (%p5353_p3), %s3082_s12, 128, %s3084_s13, %s3069_s22, %s5237_s1, %s5237_s1, %s5238_s10  }
 0x284 PF: > { %s3098_s24 = sand.u32 1, %s5213_s18   ;;  %p5592_p12 = scmp.ge.s32.totalorder %s5225_s21, 2 }
 0x285   : > { %s3099_s29 = scalar_lea.sflag [#allocation4], %s3098_s24 }
 0x286   : > { %p4943_p13 = pnand %p5592_p12, %p5304_p6 }
 0x288   : > { %p4944_p0 = pneg %p4943_p13 }
 0x28a   : > { %5208 = dma.done.wait (%p4944_p0), %s3099_s29, 128  }
 0x28b   : > { %5210 = vsyncadd (%p4944_p0), %s3099_s29, 4294967168  ;;  %p20_p5 = scmp.ge.s32.totalorder %s5343_s11, 4   ;;  %s5593_s18 = smov %s5217_s19 }
 0x28c   : > { %s5594_s19 = smov %s5221_s20  ;;  %s5595_s20 = smov %s5359_s15 }
 0x28d   : > { %s5596_s21 = smov %s5343_s11  ;;  %22 = sbr.rel (!%p20_p5) target bundleno = 9 (0x9), region = 101 }
 0x292   :  { %3105 = vsyncpa [#allocation3], 1 }
 0x293   :  { %3107 = vsyncpa [#allocation3 + $0x1], 1 }
 0x294   :  { %3108 = vsyncpa [#allocation6], 1 }
 0x295   :  { %3109 = vsyncpa [#allocation9], 1 }
 0x296   :  { %3110 = vsyncpa [#allocation4], 1 }
 0x297   :  { %3112 = vsyncpa [#allocation4 + $0x1], 1 }

</bundles_post_ra>
